<compile_context>
chip_gen: v6e
topology: v6e:2x2x1
jax: 0.10.0
libtpu: 0.0.40
codegen_flags: <defaults>
</compile_context>

<pallas_src>
import functools

import numpy as np

import jax
import jax.numpy as jnp
from jax.experimental import pallas as pl
from jax.experimental.pallas import tpu as pltpu

EPS = 1e-5


# ---------------------------------------------------------------------------
# Host-side weight preprocessing
# ---------------------------------------------------------------------------
def _conv_weight_table(w_hwio, W, C, lane_repeat, H):
    """Merged-tap weight table for the lane-flattened 3x3 'same' conv.

    Activations live as (H, L) with lane l = n*(W*C) + w*C + c (whole batch on the
    lane axis).  For every vertical tap kh in {0,1,2} and lane shift
    s in [-(2C-1), 2C-1] this builds one L-wide weight vector such that

        y[h, l] = sum_{kh, s} tab[kh*(4C-1) + s + 2C-1][l] * x[h+kh-1, (l+s) mod L]

    Horizontal / channel / batch boundaries are encoded as zeros, so lane-roll
    wrap-around (including across the batch samples sharing the lanes) contributes
    nothing.  Taps (kw, ci) mapping to the same lane shift are merged into one FMA.
    The table is pre-broadcast to H sublanes so the kernel does plain full-vreg
    loads (no per-tap sublane extract + broadcast).
    """
    nshift = 4 * C - 1
    smax = 2 * C - 1
    rows = 3 * nshift
    WC = W * C

    kh_idx = np.zeros((rows, WC), np.int32)
    co_idx = np.zeros((rows, WC), np.int32)
    ci_idx = np.zeros((3, rows, WC), np.int32)
    valid = np.zeros((3, rows, WC), np.float32)
    for kh in range(3):
        for si in range(nshift):
            s = si - smax
            r = kh * nshift + si
            for w in range(W):
                for co in range(C):
                    p = w * C + co
                    kh_idx[r, p] = kh
                    co_idx[r, p] = co
                    for kw in range(3):
                        dw = kw - 1
                        ci = co + (s - dw * C)
                        ok = (0 <= w + dw < W) and (0 <= ci < C)
                        ci_idx[kw, r, p] = min(max(ci, 0), C - 1)
                        valid[kw, r, p] = 1.0 if ok else 0.0

    tab = jnp.zeros((rows, WC), jnp.float32)
    for kw in range(3):
        tab = tab + valid[kw] * w_hwio[kh_idx, kw, ci_idx[kw], co_idx]
    tab = jnp.tile(tab.astype(jnp.float32), (1, lane_repeat))      # (rows, L)
    return jnp.broadcast_to(tab[:, None, :], (rows, H, tab.shape[1]))


# ---------------------------------------------------------------------------
# In-kernel helpers
# ---------------------------------------------------------------------------
def _conv3x3_lane(x, wtab_ref, *, H, C, L):
    """3x3 'same' conv on the lane-flattened (H, L) tile.

    Lane shifts are hoisted: 4C-2 pltpu.roll's (XLU) feed 3*(4C-1) aligned
    full-vreg FMAs (VPU).  The two vertical shifts are applied once to the per-kh
    partial sums with explicit zero boundary rows.
    """
    nshift = 4 * C - 1
    smax = 2 * C - 1
    parts = [None, None, None]
    for si in range(nshift):
        s = si - smax
        xs = x if s == 0 else pltpu.roll(x, shift=(-s) % L, axis=1)
        for kh in range(3):
            term = xs * wtab_ref[kh * nshift + si]
            parts[kh] = term if parts[kh] is None else parts[kh] + term
    zrow = jnp.zeros((1, L), x.dtype)
    top = jnp.concatenate([zrow, parts[0][:H - 1, :]], axis=0)     # row h sees x[h-1]
    bot = jnp.concatenate([parts[2][1:, :], zrow], axis=0)         # row h sees x[h+1]
    return top + parts[1] + bot


def _bn_fold(y, gamma, beta, *, C, L, count):
    """Training-mode BatchNorm folded into a per-lane affine (scale, shift).

    Sublane-reduce over H, then a log2(L/C)-step lane roll+add so every lane ends
    up holding its own channel's batch sum.  Single-pass E[y^2]-E[y]^2 variance.
    """
    s = jnp.sum(y, axis=0, keepdims=True)
    q = jnp.sum(y * y, axis=0, keepdims=True)
    t = jnp.concatenate([s, q], axis=0)                            # (2, L)
    step = C
    while step < L:
        t = t + pltpu.roll(t, shift=step, axis=1)
        step *= 2
    inv = 1.0 / count
    mean = t[0:1, :] * inv
    var = t[1:2, :] * inv - mean * mean       # biased variance (training-mode BN)
    scale = gamma * jax.lax.rsqrt(var + EPS)
    shift = beta - mean * scale
    return scale, shift


# ---------------------------------------------------------------------------
# Fused kernel
# ---------------------------------------------------------------------------
def _resblock_kernel(x_ref, w1_ref, w2_ref, bn_ref, o_ref, *, H, C, L, count):
    x = x_ref[...]

    # conv1 (+ BN1 stats) -> folded BN1 affine -> ReLU
    # (conv bias is exactly cancelled by the batch-stat BN mean subtraction)
    y1 = _conv3x3_lane(x, w1_ref, H=H, C=C, L=L)
    sc1, sh1 = _bn_fold(y1, bn_ref[0:1, :], bn_ref[1:2, :], C=C, L=L, count=count)
    h1 = jnp.maximum(y1 * sc1 + sh1, 0.0)

    # conv2 (+ BN2 stats) -> folded BN2 affine -> residual add -> ReLU
    y2 = _conv3x3_lane(h1, w2_ref, H=H, C=C, L=L)
    sc2, sh2 = _bn_fold(y2, bn_ref[2:3, :], bn_ref[3:4, :], C=C, L=L, count=count)
    o_ref[...] = jnp.maximum(y2 * sc2 + sh2 + x, 0.0)


# ---------------------------------------------------------------------------
# Public forward
# ---------------------------------------------------------------------------
def residual_block(x_nchw, params):
    """Forward of the ResidualBlock.  x_nchw: (N, C, H, W) float32."""
    w1, b1, g1, be1, w2, b2, g2, be2 = params
    del b1, b2  # exactly cancelled by training-mode BN mean subtraction
    N, C, H, W = x_nchw.shape
    L = N * W * C
    count = float(N * H * W)

    # In-lane channel reduction needs L/C to be a power of two (e.g. the target
    # shape N=2, W=16, C=4 -> L=128: fully lane-dense).
    assert L % C == 0 and ((L // C) & ((L // C) - 1)) == 0

    # NCHW -> lane-flattened (H, N*W*C): whole batch on the lane axis.  These
    # boundary transposes only exist because the public interface is NCHW.
    x = jnp.transpose(x_nchw, (2, 0, 3, 1)).reshape(H, L).astype(jnp.float32)

    wtab1 = _conv_weight_table(w1, W, C, N, H)
    wtab2 = _conv_weight_table(w2, W, C, N, H)
    bn = jnp.stack([jnp.tile(g1, N * W), jnp.tile(be1, N * W),
                    jnp.tile(g2, N * W), jnp.tile(be2, N * W)]).astype(jnp.float32)

    out = pl.pallas_call(
        functools.partial(_resblock_kernel, H=H, C=C, L=L, count=count),
        out_shape=jax.ShapeDtypeStruct((H, L), jnp.float32),
        input_output_aliases={0: 0},       # write the result in place of x
    )(x, wtab1, wtab2, bn)

    return jnp.transpose(out.reshape(H, N, W, C), (1, 3, 0, 2))


# ---------------------------------------------------------------------------
# Pure-JAX reference (keeps the conv bias; BN cancels it, so results match)
# ---------------------------------------------------------------------------
def _reference(x_nchw, params):
    w1, b1, g1, be1, w2, b2, g2, be2 = params

    def conv_bn(x, w_hwio, b, g, be):
        w_oihw = jnp.transpose(w_hwio, (3, 2, 0, 1))
        y = jax.lax.conv_general_dilated(
            x, w_oihw, window_strides=(1, 1), padding="SAME",
            dimension_numbers=("NCHW", "OIHW", "NCHW"))
        y = y + b.reshape(1, -1, 1, 1)
        mean = jnp.mean(y, axis=(0, 2, 3), keepdims=True)
        var = jnp.mean((y - mean) ** 2, axis=(0, 2, 3), keepdims=True)
        yhat = (y - mean) * jax.lax.rsqrt(var + EPS)
        return yhat * g.reshape(1, -1, 1, 1) + be.reshape(1, -1, 1, 1)

    h = jax.nn.relu(conv_bn(x_nchw, w1, b1, g1, be1))
    h = conv_bn(h, w2, b2, g2, be2) + x_nchw
    return jax.nn.relu(h)


if __name__ == "__main__":
    N, C, H, W = 2, 4, 16, 16

    key = jax.random.PRNGKey(0)
    ks = jax.random.split(key, 5)
    x = jax.random.normal(ks[0], (N, C, H, W), jnp.float32)

    # Parameters shaped like nn.Conv2d(C, C, 3, padding=1) / nn.BatchNorm2d(C).
    w1_oihw = 0.1 * jax.random.normal(ks[1], (C, C, 3, 3), jnp.float32)
    w2_oihw = 0.1 * jax.random.normal(ks[2], (C, C, 3, 3), jnp.float32)
    w1 = jnp.transpose(w1_oihw, (2, 3, 1, 0))  # HWIO
    w2 = jnp.transpose(w2_oihw, (2, 3, 1, 0))
    b1 = 0.05 * jax.random.normal(ks[3], (C,), jnp.float32)
    b2 = 0.05 * jax.random.normal(ks[4], (C,), jnp.float32)
    g1 = jnp.ones((C,), jnp.float32)
    be1 = jnp.zeros((C,), jnp.float32)
    g2 = jnp.ones((C,), jnp.float32)
    be2 = jnp.zeros((C,), jnp.float32)

    params = (w1, b1, g1, be1, w2, b2, g2, be2)

    out = jax.jit(residual_block)(x, params)
    out = jax.block_until_ready(out)

    ref = _reference(x, params)
    assert out.shape == (N, C, H, W)
    err = float(jnp.max(jnp.abs(out - ref)))
    assert err < 1e-3, f"mismatch vs reference: {err}"

    print("KERNEL_OK")
</pallas_src>

<mosaic_0001>
module attributes {stable_mosaic.version = 11 : i64} {
  func.func @_resblock_kernel(%arg0: memref<16x128xf32, #tpu.memory_space<vmem>>, %arg1: memref<45x16x128xf32, #tpu.memory_space<vmem>>, %arg2: memref<45x16x128xf32, #tpu.memory_space<vmem>>, %arg3: memref<4x128xf32, #tpu.memory_space<vmem>>, %arg4: memref<16x128xf32, #tpu.memory_space<vmem>>) attributes {dimension_semantics = [], scalar_prefetch = 0 : i64, scratch_operands = 0 : i64, tpu.core_type = #tpu.core_type<tc>} {
    %c0 = arith.constant 0 : index
    %c0_0 = arith.constant 0 : index
    %0 = vector.load %arg0[%c0, %c0_0] : memref<16x128xf32, #tpu.memory_space<vmem>>, vector<16x128xf32>
    %c7_i32 = arith.constant 7 : i32
    %1 = tpu.dynamic_rotate %0 by %c7_i32 dim 1 : vector<16x128xf32>, i32 -> vector<16x128xf32>
    %c0_1 = arith.constant 0 : index
    %c0_2 = arith.constant 0 : index
    %c0_3 = arith.constant 0 : index
    %2 = vector.load %arg1[%c0_1, %c0_2, %c0_3] : memref<45x16x128xf32, #tpu.memory_space<vmem>>, vector<1x16x128xf32>
    %3 = vector.shape_cast %2 : vector<1x16x128xf32> to vector<16x128xf32>
    %4 = arith.mulf %1, %3 : vector<16x128xf32>
    %c15 = arith.constant 15 : index
    %c0_4 = arith.constant 0 : index
    %c0_5 = arith.constant 0 : index
    %5 = vector.load %arg1[%c15, %c0_4, %c0_5] : memref<45x16x128xf32, #tpu.memory_space<vmem>>, vector<1x16x128xf32>
    %6 = vector.shape_cast %5 : vector<1x16x128xf32> to vector<16x128xf32>
    %7 = arith.mulf %1, %6 : vector<16x128xf32>
    %c30 = arith.constant 30 : index
    %c0_6 = arith.constant 0 : index
    %c0_7 = arith.constant 0 : index
    %8 = vector.load %arg1[%c30, %c0_6, %c0_7] : memref<45x16x128xf32, #tpu.memory_space<vmem>>, vector<1x16x128xf32>
    %9 = vector.shape_cast %8 : vector<1x16x128xf32> to vector<16x128xf32>
    %10 = arith.mulf %1, %9 : vector<16x128xf32>
    %c6_i32 = arith.constant 6 : i32
    %11 = tpu.dynamic_rotate %0 by %c6_i32 dim 1 : vector<16x128xf32>, i32 -> vector<16x128xf32>
    %c1 = arith.constant 1 : index
    %c0_8 = arith.constant 0 : index
    %c0_9 = arith.constant 0 : index
    %12 = vector.load %arg1[%c1, %c0_8, %c0_9] : memref<45x16x128xf32, #tpu.memory_space<vmem>>, vector<1x16x128xf32>
    %13 = vector.shape_cast %12 : vector<1x16x128xf32> to vector<16x128xf32>
    %14 = arith.mulf %11, %13 : vector<16x128xf32>
    %15 = arith.addf %4, %14 : vector<16x128xf32>
    %c16 = arith.constant 16 : index
    %c0_10 = arith.constant 0 : index
    %c0_11 = arith.constant 0 : index
    %16 = vector.load %arg1[%c16, %c0_10, %c0_11] : memref<45x16x128xf32, #tpu.memory_space<vmem>>, vector<1x16x128xf32>
    %17 = vector.shape_cast %16 : vector<1x16x128xf32> to vector<16x128xf32>
    %18 = arith.mulf %11, %17 : vector<16x128xf32>
    %19 = arith.addf %7, %18 : vector<16x128xf32>
    %c31 = arith.constant 31 : index
    %c0_12 = arith.constant 0 : index
    %c0_13 = arith.constant 0 : index
    %20 = vector.load %arg1[%c31, %c0_12, %c0_13] : memref<45x16x128xf32, #tpu.memory_space<vmem>>, vector<1x16x128xf32>
    %21 = vector.shape_cast %20 : vector<1x16x128xf32> to vector<16x128xf32>
    %22 = arith.mulf %11, %21 : vector<16x128xf32>
    %23 = arith.addf %10, %22 : vector<16x128xf32>
    %c5_i32 = arith.constant 5 : i32
    %24 = tpu.dynamic_rotate %0 by %c5_i32 dim 1 : vector<16x128xf32>, i32 -> vector<16x128xf32>
    %c2 = arith.constant 2 : index
    %c0_14 = arith.constant 0 : index
    %c0_15 = arith.constant 0 : index
    %25 = vector.load %arg1[%c2, %c0_14, %c0_15] : memref<45x16x128xf32, #tpu.memory_space<vmem>>, vector<1x16x128xf32>
    %26 = vector.shape_cast %25 : vector<1x16x128xf32> to vector<16x128xf32>
    %27 = arith.mulf %24, %26 : vector<16x128xf32>
    %28 = arith.addf %15, %27 : vector<16x128xf32>
    %c17 = arith.constant 17 : index
    %c0_16 = arith.constant 0 : index
    %c0_17 = arith.constant 0 : index
    %29 = vector.load %arg1[%c17, %c0_16, %c0_17] : memref<45x16x128xf32, #tpu.memory_space<vmem>>, vector<1x16x128xf32>
    %30 = vector.shape_cast %29 : vector<1x16x128xf32> to vector<16x128xf32>
    %31 = arith.mulf %24, %30 : vector<16x128xf32>
    %32 = arith.addf %19, %31 : vector<16x128xf32>
    %c32 = arith.constant 32 : index
    %c0_18 = arith.constant 0 : index
    %c0_19 = arith.constant 0 : index
    %33 = vector.load %arg1[%c32, %c0_18, %c0_19] : memref<45x16x128xf32, #tpu.memory_space<vmem>>, vector<1x16x128xf32>
    %34 = vector.shape_cast %33 : vector<1x16x128xf32> to vector<16x128xf32>
    %35 = arith.mulf %24, %34 : vector<16x128xf32>
    %36 = arith.addf %23, %35 : vector<16x128xf32>
    %c4_i32 = arith.constant 4 : i32
    %37 = tpu.dynamic_rotate %0 by %c4_i32 dim 1 : vector<16x128xf32>, i32 -> vector<16x128xf32>
    %c3 = arith.constant 3 : index
    %c0_20 = arith.constant 0 : index
    %c0_21 = arith.constant 0 : index
    %38 = vector.load %arg1[%c3, %c0_20, %c0_21] : memref<45x16x128xf32, #tpu.memory_space<vmem>>, vector<1x16x128xf32>
    %39 = vector.shape_cast %38 : vector<1x16x128xf32> to vector<16x128xf32>
    %40 = arith.mulf %37, %39 : vector<16x128xf32>
    %41 = arith.addf %28, %40 : vector<16x128xf32>
    %c18 = arith.constant 18 : index
    %c0_22 = arith.constant 0 : index
    %c0_23 = arith.constant 0 : index
    %42 = vector.load %arg1[%c18, %c0_22, %c0_23] : memref<45x16x128xf32, #tpu.memory_space<vmem>>, vector<1x16x128xf32>
    %43 = vector.shape_cast %42 : vector<1x16x128xf32> to vector<16x128xf32>
    %44 = arith.mulf %37, %43 : vector<16x128xf32>
    %45 = arith.addf %32, %44 : vector<16x128xf32>
    %c33 = arith.constant 33 : index
    %c0_24 = arith.constant 0 : index
    %c0_25 = arith.constant 0 : index
    %46 = vector.load %arg1[%c33, %c0_24, %c0_25] : memref<45x16x128xf32, #tpu.memory_space<vmem>>, vector<1x16x128xf32>
    %47 = vector.shape_cast %46 : vector<1x16x128xf32> to vector<16x128xf32>
    %48 = arith.mulf %37, %47 : vector<16x128xf32>
    %49 = arith.addf %36, %48 : vector<16x128xf32>
    %c3_i32 = arith.constant 3 : i32
    %50 = tpu.dynamic_rotate %0 by %c3_i32 dim 1 : vector<16x128xf32>, i32 -> vector<16x128xf32>
    %c4 = arith.constant 4 : index
    %c0_26 = arith.constant 0 : index
    %c0_27 = arith.constant 0 : index
    %51 = vector.load %arg1[%c4, %c0_26, %c0_27] : memref<45x16x128xf32, #tpu.memory_space<vmem>>, vector<1x16x128xf32>
    %52 = vector.shape_cast %51 : vector<1x16x128xf32> to vector<16x128xf32>
    %53 = arith.mulf %50, %52 : vector<16x128xf32>
    %54 = arith.addf %41, %53 : vector<16x128xf32>
    %c19 = arith.constant 19 : index
    %c0_28 = arith.constant 0 : index
    %c0_29 = arith.constant 0 : index
    %55 = vector.load %arg1[%c19, %c0_28, %c0_29] : memref<45x16x128xf32, #tpu.memory_space<vmem>>, vector<1x16x128xf32>
    %56 = vector.shape_cast %55 : vector<1x16x128xf32> to vector<16x128xf32>
    %57 = arith.mulf %50, %56 : vector<16x128xf32>
    %58 = arith.addf %45, %57 : vector<16x128xf32>
    %c34 = arith.constant 34 : index
    %c0_30 = arith.constant 0 : index
    %c0_31 = arith.constant 0 : index
    %59 = vector.load %arg1[%c34, %c0_30, %c0_31] : memref<45x16x128xf32, #tpu.memory_space<vmem>>, vector<1x16x128xf32>
    %60 = vector.shape_cast %59 : vector<1x16x128xf32> to vector<16x128xf32>
    %61 = arith.mulf %50, %60 : vector<16x128xf32>
    %62 = arith.addf %49, %61 : vector<16x128xf32>
    %c2_i32 = arith.constant 2 : i32
    %63 = tpu.dynamic_rotate %0 by %c2_i32 dim 1 : vector<16x128xf32>, i32 -> vector<16x128xf32>
    %c5 = arith.constant 5 : index
    %c0_32 = arith.constant 0 : index
    %c0_33 = arith.constant 0 : index
    %64 = vector.load %arg1[%c5, %c0_32, %c0_33] : memref<45x16x128xf32, #tpu.memory_space<vmem>>, vector<1x16x128xf32>
    %65 = vector.shape_cast %64 : vector<1x16x128xf32> to vector<16x128xf32>
    %66 = arith.mulf %63, %65 : vector<16x128xf32>
    %67 = arith.addf %54, %66 : vector<16x128xf32>
    %c20 = arith.constant 20 : index
    %c0_34 = arith.constant 0 : index
    %c0_35 = arith.constant 0 : index
    %68 = vector.load %arg1[%c20, %c0_34, %c0_35] : memref<45x16x128xf32, #tpu.memory_space<vmem>>, vector<1x16x128xf32>
    %69 = vector.shape_cast %68 : vector<1x16x128xf32> to vector<16x128xf32>
    %70 = arith.mulf %63, %69 : vector<16x128xf32>
    %71 = arith.addf %58, %70 : vector<16x128xf32>
    %c35 = arith.constant 35 : index
    %c0_36 = arith.constant 0 : index
    %c0_37 = arith.constant 0 : index
    %72 = vector.load %arg1[%c35, %c0_36, %c0_37] : memref<45x16x128xf32, #tpu.memory_space<vmem>>, vector<1x16x128xf32>
    %73 = vector.shape_cast %72 : vector<1x16x128xf32> to vector<16x128xf32>
    %74 = arith.mulf %63, %73 : vector<16x128xf32>
    %75 = arith.addf %62, %74 : vector<16x128xf32>
    %c1_i32 = arith.constant 1 : i32
    %76 = tpu.dynamic_rotate %0 by %c1_i32 dim 1 : vector<16x128xf32>, i32 -> vector<16x128xf32>
    %c6 = arith.constant 6 : index
    %c0_38 = arith.constant 0 : index
    %c0_39 = arith.constant 0 : index
    %77 = vector.load %arg1[%c6, %c0_38, %c0_39] : memref<45x16x128xf32, #tpu.memory_space<vmem>>, vector<1x16x128xf32>
    %78 = vector.shape_cast %77 : vector<1x16x128xf32> to vector<16x128xf32>
    %79 = arith.mulf %76, %78 : vector<16x128xf32>
    %80 = arith.addf %67, %79 : vector<16x128xf32>
    %c21 = arith.constant 21 : index
    %c0_40 = arith.constant 0 : index
    %c0_41 = arith.constant 0 : index
    %81 = vector.load %arg1[%c21, %c0_40, %c0_41] : memref<45x16x128xf32, #tpu.memory_space<vmem>>, vector<1x16x128xf32>
    %82 = vector.shape_cast %81 : vector<1x16x128xf32> to vector<16x128xf32>
    %83 = arith.mulf %76, %82 : vector<16x128xf32>
    %84 = arith.addf %71, %83 : vector<16x128xf32>
    %c36 = arith.constant 36 : index
    %c0_42 = arith.constant 0 : index
    %c0_43 = arith.constant 0 : index
    %85 = vector.load %arg1[%c36, %c0_42, %c0_43] : memref<45x16x128xf32, #tpu.memory_space<vmem>>, vector<1x16x128xf32>
    %86 = vector.shape_cast %85 : vector<1x16x128xf32> to vector<16x128xf32>
    %87 = arith.mulf %76, %86 : vector<16x128xf32>
    %88 = arith.addf %75, %87 : vector<16x128xf32>
    %c7 = arith.constant 7 : index
    %c0_44 = arith.constant 0 : index
    %c0_45 = arith.constant 0 : index
    %89 = vector.load %arg1[%c7, %c0_44, %c0_45] : memref<45x16x128xf32, #tpu.memory_space<vmem>>, vector<1x16x128xf32>
    %90 = vector.shape_cast %89 : vector<1x16x128xf32> to vector<16x128xf32>
    %91 = arith.mulf %0, %90 : vector<16x128xf32>
    %92 = arith.addf %80, %91 : vector<16x128xf32>
    %c22 = arith.constant 22 : index
    %c0_46 = arith.constant 0 : index
    %c0_47 = arith.constant 0 : index
    %93 = vector.load %arg1[%c22, %c0_46, %c0_47] : memref<45x16x128xf32, #tpu.memory_space<vmem>>, vector<1x16x128xf32>
    %94 = vector.shape_cast %93 : vector<1x16x128xf32> to vector<16x128xf32>
    %95 = arith.mulf %0, %94 : vector<16x128xf32>
    %96 = arith.addf %84, %95 : vector<16x128xf32>
    %c37 = arith.constant 37 : index
    %c0_48 = arith.constant 0 : index
    %c0_49 = arith.constant 0 : index
    %97 = vector.load %arg1[%c37, %c0_48, %c0_49] : memref<45x16x128xf32, #tpu.memory_space<vmem>>, vector<1x16x128xf32>
    %98 = vector.shape_cast %97 : vector<1x16x128xf32> to vector<16x128xf32>
    %99 = arith.mulf %0, %98 : vector<16x128xf32>
    %100 = arith.addf %88, %99 : vector<16x128xf32>
    %c127_i32 = arith.constant 127 : i32
    %101 = tpu.dynamic_rotate %0 by %c127_i32 dim 1 : vector<16x128xf32>, i32 -> vector<16x128xf32>
    %c8 = arith.constant 8 : index
    %c0_50 = arith.constant 0 : index
    %c0_51 = arith.constant 0 : index
    %102 = vector.load %arg1[%c8, %c0_50, %c0_51] : memref<45x16x128xf32, #tpu.memory_space<vmem>>, vector<1x16x128xf32>
    %103 = vector.shape_cast %102 : vector<1x16x128xf32> to vector<16x128xf32>
    %104 = arith.mulf %101, %103 : vector<16x128xf32>
    %105 = arith.addf %92, %104 : vector<16x128xf32>
    %c23 = arith.constant 23 : index
    %c0_52 = arith.constant 0 : index
    %c0_53 = arith.constant 0 : index
    %106 = vector.load %arg1[%c23, %c0_52, %c0_53] : memref<45x16x128xf32, #tpu.memory_space<vmem>>, vector<1x16x128xf32>
    %107 = vector.shape_cast %106 : vector<1x16x128xf32> to vector<16x128xf32>
    %108 = arith.mulf %101, %107 : vector<16x128xf32>
    %109 = arith.addf %96, %108 : vector<16x128xf32>
    %c38 = arith.constant 38 : index
    %c0_54 = arith.constant 0 : index
    %c0_55 = arith.constant 0 : index
    %110 = vector.load %arg1[%c38, %c0_54, %c0_55] : memref<45x16x128xf32, #tpu.memory_space<vmem>>, vector<1x16x128xf32>
    %111 = vector.shape_cast %110 : vector<1x16x128xf32> to vector<16x128xf32>
    %112 = arith.mulf %101, %111 : vector<16x128xf32>
    %113 = arith.addf %100, %112 : vector<16x128xf32>
    %c126_i32 = arith.constant 126 : i32
    %114 = tpu.dynamic_rotate %0 by %c126_i32 dim 1 : vector<16x128xf32>, i32 -> vector<16x128xf32>
    %c9 = arith.constant 9 : index
    %c0_56 = arith.constant 0 : index
    %c0_57 = arith.constant 0 : index
    %115 = vector.load %arg1[%c9, %c0_56, %c0_57] : memref<45x16x128xf32, #tpu.memory_space<vmem>>, vector<1x16x128xf32>
    %116 = vector.shape_cast %115 : vector<1x16x128xf32> to vector<16x128xf32>
    %117 = arith.mulf %114, %116 : vector<16x128xf32>
    %118 = arith.addf %105, %117 : vector<16x128xf32>
    %c24 = arith.constant 24 : index
    %c0_58 = arith.constant 0 : index
    %c0_59 = arith.constant 0 : index
    %119 = vector.load %arg1[%c24, %c0_58, %c0_59] : memref<45x16x128xf32, #tpu.memory_space<vmem>>, vector<1x16x128xf32>
    %120 = vector.shape_cast %119 : vector<1x16x128xf32> to vector<16x128xf32>
    %121 = arith.mulf %114, %120 : vector<16x128xf32>
    %122 = arith.addf %109, %121 : vector<16x128xf32>
    %c39 = arith.constant 39 : index
    %c0_60 = arith.constant 0 : index
    %c0_61 = arith.constant 0 : index
    %123 = vector.load %arg1[%c39, %c0_60, %c0_61] : memref<45x16x128xf32, #tpu.memory_space<vmem>>, vector<1x16x128xf32>
    %124 = vector.shape_cast %123 : vector<1x16x128xf32> to vector<16x128xf32>
    %125 = arith.mulf %114, %124 : vector<16x128xf32>
    %126 = arith.addf %113, %125 : vector<16x128xf32>
    %c125_i32 = arith.constant 125 : i32
    %127 = tpu.dynamic_rotate %0 by %c125_i32 dim 1 : vector<16x128xf32>, i32 -> vector<16x128xf32>
    %c10 = arith.constant 10 : index
    %c0_62 = arith.constant 0 : index
    %c0_63 = arith.constant 0 : index
    %128 = vector.load %arg1[%c10, %c0_62, %c0_63] : memref<45x16x128xf32, #tpu.memory_space<vmem>>, vector<1x16x128xf32>
    %129 = vector.shape_cast %128 : vector<1x16x128xf32> to vector<16x128xf32>
    %130 = arith.mulf %127, %129 : vector<16x128xf32>
    %131 = arith.addf %118, %130 : vector<16x128xf32>
    %c25 = arith.constant 25 : index
    %c0_64 = arith.constant 0 : index
    %c0_65 = arith.constant 0 : index
    %132 = vector.load %arg1[%c25, %c0_64, %c0_65] : memref<45x16x128xf32, #tpu.memory_space<vmem>>, vector<1x16x128xf32>
    %133 = vector.shape_cast %132 : vector<1x16x128xf32> to vector<16x128xf32>
    %134 = arith.mulf %127, %133 : vector<16x128xf32>
    %135 = arith.addf %122, %134 : vector<16x128xf32>
    %c40 = arith.constant 40 : index
    %c0_66 = arith.constant 0 : index
    %c0_67 = arith.constant 0 : index
    %136 = vector.load %arg1[%c40, %c0_66, %c0_67] : memref<45x16x128xf32, #tpu.memory_space<vmem>>, vector<1x16x128xf32>
    %137 = vector.shape_cast %136 : vector<1x16x128xf32> to vector<16x128xf32>
    %138 = arith.mulf %127, %137 : vector<16x128xf32>
    %139 = arith.addf %126, %138 : vector<16x128xf32>
    %c124_i32 = arith.constant 124 : i32
    %140 = tpu.dynamic_rotate %0 by %c124_i32 dim 1 : vector<16x128xf32>, i32 -> vector<16x128xf32>
    %c11 = arith.constant 11 : index
    %c0_68 = arith.constant 0 : index
    %c0_69 = arith.constant 0 : index
    %141 = vector.load %arg1[%c11, %c0_68, %c0_69] : memref<45x16x128xf32, #tpu.memory_space<vmem>>, vector<1x16x128xf32>
    %142 = vector.shape_cast %141 : vector<1x16x128xf32> to vector<16x128xf32>
    %143 = arith.mulf %140, %142 : vector<16x128xf32>
    %144 = arith.addf %131, %143 : vector<16x128xf32>
    %c26 = arith.constant 26 : index
    %c0_70 = arith.constant 0 : index
    %c0_71 = arith.constant 0 : index
    %145 = vector.load %arg1[%c26, %c0_70, %c0_71] : memref<45x16x128xf32, #tpu.memory_space<vmem>>, vector<1x16x128xf32>
    %146 = vector.shape_cast %145 : vector<1x16x128xf32> to vector<16x128xf32>
    %147 = arith.mulf %140, %146 : vector<16x128xf32>
    %148 = arith.addf %135, %147 : vector<16x128xf32>
    %c41 = arith.constant 41 : index
    %c0_72 = arith.constant 0 : index
    %c0_73 = arith.constant 0 : index
    %149 = vector.load %arg1[%c41, %c0_72, %c0_73] : memref<45x16x128xf32, #tpu.memory_space<vmem>>, vector<1x16x128xf32>
    %150 = vector.shape_cast %149 : vector<1x16x128xf32> to vector<16x128xf32>
    %151 = arith.mulf %140, %150 : vector<16x128xf32>
    %152 = arith.addf %139, %151 : vector<16x128xf32>
    %c123_i32 = arith.constant 123 : i32
    %153 = tpu.dynamic_rotate %0 by %c123_i32 dim 1 : vector<16x128xf32>, i32 -> vector<16x128xf32>
    %c12 = arith.constant 12 : index
    %c0_74 = arith.constant 0 : index
    %c0_75 = arith.constant 0 : index
    %154 = vector.load %arg1[%c12, %c0_74, %c0_75] : memref<45x16x128xf32, #tpu.memory_space<vmem>>, vector<1x16x128xf32>
    %155 = vector.shape_cast %154 : vector<1x16x128xf32> to vector<16x128xf32>
    %156 = arith.mulf %153, %155 : vector<16x128xf32>
    %157 = arith.addf %144, %156 : vector<16x128xf32>
    %c27 = arith.constant 27 : index
    %c0_76 = arith.constant 0 : index
    %c0_77 = arith.constant 0 : index
    %158 = vector.load %arg1[%c27, %c0_76, %c0_77] : memref<45x16x128xf32, #tpu.memory_space<vmem>>, vector<1x16x128xf32>
    %159 = vector.shape_cast %158 : vector<1x16x128xf32> to vector<16x128xf32>
    %160 = arith.mulf %153, %159 : vector<16x128xf32>
    %161 = arith.addf %148, %160 : vector<16x128xf32>
    %c42 = arith.constant 42 : index
    %c0_78 = arith.constant 0 : index
    %c0_79 = arith.constant 0 : index
    %162 = vector.load %arg1[%c42, %c0_78, %c0_79] : memref<45x16x128xf32, #tpu.memory_space<vmem>>, vector<1x16x128xf32>
    %163 = vector.shape_cast %162 : vector<1x16x128xf32> to vector<16x128xf32>
    %164 = arith.mulf %153, %163 : vector<16x128xf32>
    %165 = arith.addf %152, %164 : vector<16x128xf32>
    %c122_i32 = arith.constant 122 : i32
    %166 = tpu.dynamic_rotate %0 by %c122_i32 dim 1 : vector<16x128xf32>, i32 -> vector<16x128xf32>
    %c13 = arith.constant 13 : index
    %c0_80 = arith.constant 0 : index
    %c0_81 = arith.constant 0 : index
    %167 = vector.load %arg1[%c13, %c0_80, %c0_81] : memref<45x16x128xf32, #tpu.memory_space<vmem>>, vector<1x16x128xf32>
    %168 = vector.shape_cast %167 : vector<1x16x128xf32> to vector<16x128xf32>
    %169 = arith.mulf %166, %168 : vector<16x128xf32>
    %170 = arith.addf %157, %169 : vector<16x128xf32>
    %c28 = arith.constant 28 : index
    %c0_82 = arith.constant 0 : index
    %c0_83 = arith.constant 0 : index
    %171 = vector.load %arg1[%c28, %c0_82, %c0_83] : memref<45x16x128xf32, #tpu.memory_space<vmem>>, vector<1x16x128xf32>
    %172 = vector.shape_cast %171 : vector<1x16x128xf32> to vector<16x128xf32>
    %173 = arith.mulf %166, %172 : vector<16x128xf32>
    %174 = arith.addf %161, %173 : vector<16x128xf32>
    %c43 = arith.constant 43 : index
    %c0_84 = arith.constant 0 : index
    %c0_85 = arith.constant 0 : index
    %175 = vector.load %arg1[%c43, %c0_84, %c0_85] : memref<45x16x128xf32, #tpu.memory_space<vmem>>, vector<1x16x128xf32>
    %176 = vector.shape_cast %175 : vector<1x16x128xf32> to vector<16x128xf32>
    %177 = arith.mulf %166, %176 : vector<16x128xf32>
    %178 = arith.addf %165, %177 : vector<16x128xf32>
    %c121_i32 = arith.constant 121 : i32
    %179 = tpu.dynamic_rotate %0 by %c121_i32 dim 1 : vector<16x128xf32>, i32 -> vector<16x128xf32>
    %c14 = arith.constant 14 : index
    %c0_86 = arith.constant 0 : index
    %c0_87 = arith.constant 0 : index
    %180 = vector.load %arg1[%c14, %c0_86, %c0_87] : memref<45x16x128xf32, #tpu.memory_space<vmem>>, vector<1x16x128xf32>
    %181 = vector.shape_cast %180 : vector<1x16x128xf32> to vector<16x128xf32>
    %182 = arith.mulf %179, %181 : vector<16x128xf32>
    %183 = arith.addf %170, %182 : vector<16x128xf32>
    %c29 = arith.constant 29 : index
    %c0_88 = arith.constant 0 : index
    %c0_89 = arith.constant 0 : index
    %184 = vector.load %arg1[%c29, %c0_88, %c0_89] : memref<45x16x128xf32, #tpu.memory_space<vmem>>, vector<1x16x128xf32>
    %185 = vector.shape_cast %184 : vector<1x16x128xf32> to vector<16x128xf32>
    %186 = arith.mulf %179, %185 : vector<16x128xf32>
    %187 = arith.addf %174, %186 : vector<16x128xf32>
    %c44 = arith.constant 44 : index
    %c0_90 = arith.constant 0 : index
    %c0_91 = arith.constant 0 : index
    %188 = vector.load %arg1[%c44, %c0_90, %c0_91] : memref<45x16x128xf32, #tpu.memory_space<vmem>>, vector<1x16x128xf32>
    %189 = vector.shape_cast %188 : vector<1x16x128xf32> to vector<16x128xf32>
    %190 = arith.mulf %179, %189 : vector<16x128xf32>
    %191 = arith.addf %178, %190 : vector<16x128xf32>
    %cst = arith.constant 0.000000e+00 : f32
    %192 = vector.broadcast %cst : f32 to vector<1x128xf32>
    %193 = vector.extract_strided_slice %183 {offsets = [0, 0], sizes = [15, 128], strides = [1, 1]} : vector<16x128xf32> to vector<15x128xf32>
    %194 = tpu.concatenate %192, %193 in 0 : vector<1x128xf32>, vector<15x128xf32> -> vector<16x128xf32>
    %195 = vector.extract_strided_slice %191 {offsets = [1, 0], sizes = [15, 128], strides = [1, 1]} : vector<16x128xf32> to vector<15x128xf32>
    %196 = tpu.concatenate %195, %192 in 0 : vector<15x128xf32>, vector<1x128xf32> -> vector<16x128xf32>
    %197 = arith.addf %194, %187 : vector<16x128xf32>
    %198 = arith.addf %197, %196 : vector<16x128xf32>
    %c0_92 = arith.constant 0 : index
    %c0_93 = arith.constant 0 : index
    %199 = vector.load %arg3[%c0_92, %c0_93] : memref<4x128xf32, #tpu.memory_space<vmem>>, vector<1x128xf32>
    %c1_94 = arith.constant 1 : index
    %c0_95 = arith.constant 0 : index
    %200 = vector.load %arg3[%c1_94, %c0_95] : memref<4x128xf32, #tpu.memory_space<vmem>>, vector<1x128xf32>
    %cst_96 = arith.constant dense<0.000000e+00> : vector<128xf32>
    %201 = vector.multi_reduction <add>, %198, %cst_96 [0] : vector<16x128xf32> to vector<128xf32>
    %202 = vector.shape_cast %201 : vector<128xf32> to vector<1x128xf32>
    %203 = arith.mulf %198, %198 : vector<16x128xf32>
    %cst_97 = arith.constant dense<0.000000e+00> : vector<128xf32>
    %204 = vector.multi_reduction <add>, %203, %cst_97 [0] : vector<16x128xf32> to vector<128xf32>
    %205 = vector.shape_cast %204 : vector<128xf32> to vector<1x128xf32>
    %206 = tpu.concatenate %202, %205 in 0 : vector<1x128xf32>, vector<1x128xf32> -> vector<2x128xf32>
    %c4_i32_98 = arith.constant 4 : i32
    %207 = tpu.dynamic_rotate %206 by %c4_i32_98 dim 1 : vector<2x128xf32>, i32 -> vector<2x128xf32>
    %208 = arith.addf %206, %207 : vector<2x128xf32>
    %c8_i32 = arith.constant 8 : i32
    %209 = tpu.dynamic_rotate %208 by %c8_i32 dim 1 : vector<2x128xf32>, i32 -> vector<2x128xf32>
    %210 = arith.addf %208, %209 : vector<2x128xf32>
    %c16_i32 = arith.constant 16 : i32
    %211 = tpu.dynamic_rotate %210 by %c16_i32 dim 1 : vector<2x128xf32>, i32 -> vector<2x128xf32>
    %212 = arith.addf %210, %211 : vector<2x128xf32>
    %c32_i32 = arith.constant 32 : i32
    %213 = tpu.dynamic_rotate %212 by %c32_i32 dim 1 : vector<2x128xf32>, i32 -> vector<2x128xf32>
    %214 = arith.addf %212, %213 : vector<2x128xf32>
    %c64_i32 = arith.constant 64 : i32
    %215 = tpu.dynamic_rotate %214 by %c64_i32 dim 1 : vector<2x128xf32>, i32 -> vector<2x128xf32>
    %216 = arith.addf %214, %215 : vector<2x128xf32>
    %217 = vector.extract_strided_slice %216 {offsets = [0, 0], sizes = [1, 128], strides = [1, 1]} : vector<2x128xf32> to vector<1x128xf32>
    %cst_99 = arith.constant 0.001953125 : f32
    %218 = vector.broadcast %cst_99 : f32 to vector<1x128xf32>
    %219 = arith.mulf %217, %218 : vector<1x128xf32>
    %220 = vector.extract_strided_slice %216 {offsets = [1, 0], sizes = [1, 128], strides = [1, 1]} : vector<2x128xf32> to vector<1x128xf32>
    %cst_100 = arith.constant 0.001953125 : f32
    %221 = vector.broadcast %cst_100 : f32 to vector<1x128xf32>
    %222 = arith.mulf %220, %221 : vector<1x128xf32>
    %223 = arith.mulf %219, %219 : vector<1x128xf32>
    %224 = arith.subf %222, %223 : vector<1x128xf32>
    %cst_101 = arith.constant 9.99999974E-6 : f32
    %225 = vector.broadcast %cst_101 : f32 to vector<1x128xf32>
    %226 = arith.addf %224, %225 : vector<1x128xf32>
    %227 = math.rsqrt %226 : vector<1x128xf32>
    %228 = arith.mulf %199, %227 : vector<1x128xf32>
    %229 = arith.mulf %219, %228 : vector<1x128xf32>
    %230 = arith.subf %200, %229 : vector<1x128xf32>
    %231 = vector.broadcast %228 : vector<1x128xf32> to vector<16x128xf32>
    %232 = arith.mulf %198, %231 : vector<16x128xf32>
    %233 = vector.broadcast %230 : vector<1x128xf32> to vector<16x128xf32>
    %234 = arith.addf %232, %233 : vector<16x128xf32>
    %cst_102 = arith.constant 0.000000e+00 : f32
    %235 = vector.broadcast %cst_102 : f32 to vector<16x128xf32>
    %236 = arith.maximumf %234, %235 : vector<16x128xf32>
    %c7_i32_103 = arith.constant 7 : i32
    %237 = tpu.dynamic_rotate %236 by %c7_i32_103 dim 1 : vector<16x128xf32>, i32 -> vector<16x128xf32>
    %c0_104 = arith.constant 0 : index
    %c0_105 = arith.constant 0 : index
    %c0_106 = arith.constant 0 : index
    %238 = vector.load %arg2[%c0_104, %c0_105, %c0_106] : memref<45x16x128xf32, #tpu.memory_space<vmem>>, vector<1x16x128xf32>
    %239 = vector.shape_cast %238 : vector<1x16x128xf32> to vector<16x128xf32>
    %240 = arith.mulf %237, %239 : vector<16x128xf32>
    %c15_107 = arith.constant 15 : index
    %c0_108 = arith.constant 0 : index
    %c0_109 = arith.constant 0 : index
    %241 = vector.load %arg2[%c15_107, %c0_108, %c0_109] : memref<45x16x128xf32, #tpu.memory_space<vmem>>, vector<1x16x128xf32>
    %242 = vector.shape_cast %241 : vector<1x16x128xf32> to vector<16x128xf32>
    %243 = arith.mulf %237, %242 : vector<16x128xf32>
    %c30_110 = arith.constant 30 : index
    %c0_111 = arith.constant 0 : index
    %c0_112 = arith.constant 0 : index
    %244 = vector.load %arg2[%c30_110, %c0_111, %c0_112] : memref<45x16x128xf32, #tpu.memory_space<vmem>>, vector<1x16x128xf32>
    %245 = vector.shape_cast %244 : vector<1x16x128xf32> to vector<16x128xf32>
    %246 = arith.mulf %237, %245 : vector<16x128xf32>
    %c6_i32_113 = arith.constant 6 : i32
    %247 = tpu.dynamic_rotate %236 by %c6_i32_113 dim 1 : vector<16x128xf32>, i32 -> vector<16x128xf32>
    %c1_114 = arith.constant 1 : index
    %c0_115 = arith.constant 0 : index
    %c0_116 = arith.constant 0 : index
    %248 = vector.load %arg2[%c1_114, %c0_115, %c0_116] : memref<45x16x128xf32, #tpu.memory_space<vmem>>, vector<1x16x128xf32>
    %249 = vector.shape_cast %248 : vector<1x16x128xf32> to vector<16x128xf32>
    %250 = arith.mulf %247, %249 : vector<16x128xf32>
    %251 = arith.addf %240, %250 : vector<16x128xf32>
    %c16_117 = arith.constant 16 : index
    %c0_118 = arith.constant 0 : index
    %c0_119 = arith.constant 0 : index
    %252 = vector.load %arg2[%c16_117, %c0_118, %c0_119] : memref<45x16x128xf32, #tpu.memory_space<vmem>>, vector<1x16x128xf32>
    %253 = vector.shape_cast %252 : vector<1x16x128xf32> to vector<16x128xf32>
    %254 = arith.mulf %247, %253 : vector<16x128xf32>
    %255 = arith.addf %243, %254 : vector<16x128xf32>
    %c31_120 = arith.constant 31 : index
    %c0_121 = arith.constant 0 : index
    %c0_122 = arith.constant 0 : index
    %256 = vector.load %arg2[%c31_120, %c0_121, %c0_122] : memref<45x16x128xf32, #tpu.memory_space<vmem>>, vector<1x16x128xf32>
    %257 = vector.shape_cast %256 : vector<1x16x128xf32> to vector<16x128xf32>
    %258 = arith.mulf %247, %257 : vector<16x128xf32>
    %259 = arith.addf %246, %258 : vector<16x128xf32>
    %c5_i32_123 = arith.constant 5 : i32
    %260 = tpu.dynamic_rotate %236 by %c5_i32_123 dim 1 : vector<16x128xf32>, i32 -> vector<16x128xf32>
    %c2_124 = arith.constant 2 : index
    %c0_125 = arith.constant 0 : index
    %c0_126 = arith.constant 0 : index
    %261 = vector.load %arg2[%c2_124, %c0_125, %c0_126] : memref<45x16x128xf32, #tpu.memory_space<vmem>>, vector<1x16x128xf32>
    %262 = vector.shape_cast %261 : vector<1x16x128xf32> to vector<16x128xf32>
    %263 = arith.mulf %260, %262 : vector<16x128xf32>
    %264 = arith.addf %251, %263 : vector<16x128xf32>
    %c17_127 = arith.constant 17 : index
    %c0_128 = arith.constant 0 : index
    %c0_129 = arith.constant 0 : index
    %265 = vector.load %arg2[%c17_127, %c0_128, %c0_129] : memref<45x16x128xf32, #tpu.memory_space<vmem>>, vector<1x16x128xf32>
    %266 = vector.shape_cast %265 : vector<1x16x128xf32> to vector<16x128xf32>
    %267 = arith.mulf %260, %266 : vector<16x128xf32>
    %268 = arith.addf %255, %267 : vector<16x128xf32>
    %c32_130 = arith.constant 32 : index
    %c0_131 = arith.constant 0 : index
    %c0_132 = arith.constant 0 : index
    %269 = vector.load %arg2[%c32_130, %c0_131, %c0_132] : memref<45x16x128xf32, #tpu.memory_space<vmem>>, vector<1x16x128xf32>
    %270 = vector.shape_cast %269 : vector<1x16x128xf32> to vector<16x128xf32>
    %271 = arith.mulf %260, %270 : vector<16x128xf32>
    %272 = arith.addf %259, %271 : vector<16x128xf32>
    %c4_i32_133 = arith.constant 4 : i32
    %273 = tpu.dynamic_rotate %236 by %c4_i32_133 dim 1 : vector<16x128xf32>, i32 -> vector<16x128xf32>
    %c3_134 = arith.constant 3 : index
    %c0_135 = arith.constant 0 : index
    %c0_136 = arith.constant 0 : index
    %274 = vector.load %arg2[%c3_134, %c0_135, %c0_136] : memref<45x16x128xf32, #tpu.memory_space<vmem>>, vector<1x16x128xf32>
    %275 = vector.shape_cast %274 : vector<1x16x128xf32> to vector<16x128xf32>
    %276 = arith.mulf %273, %275 : vector<16x128xf32>
    %277 = arith.addf %264, %276 : vector<16x128xf32>
    %c18_137 = arith.constant 18 : index
    %c0_138 = arith.constant 0 : index
    %c0_139 = arith.constant 0 : index
    %278 = vector.load %arg2[%c18_137, %c0_138, %c0_139] : memref<45x16x128xf32, #tpu.memory_space<vmem>>, vector<1x16x128xf32>
    %279 = vector.shape_cast %278 : vector<1x16x128xf32> to vector<16x128xf32>
    %280 = arith.mulf %273, %279 : vector<16x128xf32>
    %281 = arith.addf %268, %280 : vector<16x128xf32>
    %c33_140 = arith.constant 33 : index
    %c0_141 = arith.constant 0 : index
    %c0_142 = arith.constant 0 : index
    %282 = vector.load %arg2[%c33_140, %c0_141, %c0_142] : memref<45x16x128xf32, #tpu.memory_space<vmem>>, vector<1x16x128xf32>
    %283 = vector.shape_cast %282 : vector<1x16x128xf32> to vector<16x128xf32>
    %284 = arith.mulf %273, %283 : vector<16x128xf32>
    %285 = arith.addf %272, %284 : vector<16x128xf32>
    %c3_i32_143 = arith.constant 3 : i32
    %286 = tpu.dynamic_rotate %236 by %c3_i32_143 dim 1 : vector<16x128xf32>, i32 -> vector<16x128xf32>
    %c4_144 = arith.constant 4 : index
    %c0_145 = arith.constant 0 : index
    %c0_146 = arith.constant 0 : index
    %287 = vector.load %arg2[%c4_144, %c0_145, %c0_146] : memref<45x16x128xf32, #tpu.memory_space<vmem>>, vector<1x16x128xf32>
    %288 = vector.shape_cast %287 : vector<1x16x128xf32> to vector<16x128xf32>
    %289 = arith.mulf %286, %288 : vector<16x128xf32>
    %290 = arith.addf %277, %289 : vector<16x128xf32>
    %c19_147 = arith.constant 19 : index
    %c0_148 = arith.constant 0 : index
    %c0_149 = arith.constant 0 : index
    %291 = vector.load %arg2[%c19_147, %c0_148, %c0_149] : memref<45x16x128xf32, #tpu.memory_space<vmem>>, vector<1x16x128xf32>
    %292 = vector.shape_cast %291 : vector<1x16x128xf32> to vector<16x128xf32>
    %293 = arith.mulf %286, %292 : vector<16x128xf32>
    %294 = arith.addf %281, %293 : vector<16x128xf32>
    %c34_150 = arith.constant 34 : index
    %c0_151 = arith.constant 0 : index
    %c0_152 = arith.constant 0 : index
    %295 = vector.load %arg2[%c34_150, %c0_151, %c0_152] : memref<45x16x128xf32, #tpu.memory_space<vmem>>, vector<1x16x128xf32>
    %296 = vector.shape_cast %295 : vector<1x16x128xf32> to vector<16x128xf32>
    %297 = arith.mulf %286, %296 : vector<16x128xf32>
    %298 = arith.addf %285, %297 : vector<16x128xf32>
    %c2_i32_153 = arith.constant 2 : i32
    %299 = tpu.dynamic_rotate %236 by %c2_i32_153 dim 1 : vector<16x128xf32>, i32 -> vector<16x128xf32>
    %c5_154 = arith.constant 5 : index
    %c0_155 = arith.constant 0 : index
    %c0_156 = arith.constant 0 : index
    %300 = vector.load %arg2[%c5_154, %c0_155, %c0_156] : memref<45x16x128xf32, #tpu.memory_space<vmem>>, vector<1x16x128xf32>
    %301 = vector.shape_cast %300 : vector<1x16x128xf32> to vector<16x128xf32>
    %302 = arith.mulf %299, %301 : vector<16x128xf32>
    %303 = arith.addf %290, %302 : vector<16x128xf32>
    %c20_157 = arith.constant 20 : index
    %c0_158 = arith.constant 0 : index
    %c0_159 = arith.constant 0 : index
    %304 = vector.load %arg2[%c20_157, %c0_158, %c0_159] : memref<45x16x128xf32, #tpu.memory_space<vmem>>, vector<1x16x128xf32>
    %305 = vector.shape_cast %304 : vector<1x16x128xf32> to vector<16x128xf32>
    %306 = arith.mulf %299, %305 : vector<16x128xf32>
    %307 = arith.addf %294, %306 : vector<16x128xf32>
    %c35_160 = arith.constant 35 : index
    %c0_161 = arith.constant 0 : index
    %c0_162 = arith.constant 0 : index
    %308 = vector.load %arg2[%c35_160, %c0_161, %c0_162] : memref<45x16x128xf32, #tpu.memory_space<vmem>>, vector<1x16x128xf32>
    %309 = vector.shape_cast %308 : vector<1x16x128xf32> to vector<16x128xf32>
    %310 = arith.mulf %299, %309 : vector<16x128xf32>
    %311 = arith.addf %298, %310 : vector<16x128xf32>
    %c1_i32_163 = arith.constant 1 : i32
    %312 = tpu.dynamic_rotate %236 by %c1_i32_163 dim 1 : vector<16x128xf32>, i32 -> vector<16x128xf32>
    %c6_164 = arith.constant 6 : index
    %c0_165 = arith.constant 0 : index
    %c0_166 = arith.constant 0 : index
    %313 = vector.load %arg2[%c6_164, %c0_165, %c0_166] : memref<45x16x128xf32, #tpu.memory_space<vmem>>, vector<1x16x128xf32>
    %314 = vector.shape_cast %313 : vector<1x16x128xf32> to vector<16x128xf32>
    %315 = arith.mulf %312, %314 : vector<16x128xf32>
    %316 = arith.addf %303, %315 : vector<16x128xf32>
    %c21_167 = arith.constant 21 : index
    %c0_168 = arith.constant 0 : index
    %c0_169 = arith.constant 0 : index
    %317 = vector.load %arg2[%c21_167, %c0_168, %c0_169] : memref<45x16x128xf32, #tpu.memory_space<vmem>>, vector<1x16x128xf32>
    %318 = vector.shape_cast %317 : vector<1x16x128xf32> to vector<16x128xf32>
    %319 = arith.mulf %312, %318 : vector<16x128xf32>
    %320 = arith.addf %307, %319 : vector<16x128xf32>
    %c36_170 = arith.constant 36 : index
    %c0_171 = arith.constant 0 : index
    %c0_172 = arith.constant 0 : index
    %321 = vector.load %arg2[%c36_170, %c0_171, %c0_172] : memref<45x16x128xf32, #tpu.memory_space<vmem>>, vector<1x16x128xf32>
    %322 = vector.shape_cast %321 : vector<1x16x128xf32> to vector<16x128xf32>
    %323 = arith.mulf %312, %322 : vector<16x128xf32>
    %324 = arith.addf %311, %323 : vector<16x128xf32>
    %c7_173 = arith.constant 7 : index
    %c0_174 = arith.constant 0 : index
    %c0_175 = arith.constant 0 : index
    %325 = vector.load %arg2[%c7_173, %c0_174, %c0_175] : memref<45x16x128xf32, #tpu.memory_space<vmem>>, vector<1x16x128xf32>
    %326 = vector.shape_cast %325 : vector<1x16x128xf32> to vector<16x128xf32>
    %327 = arith.mulf %236, %326 : vector<16x128xf32>
    %328 = arith.addf %316, %327 : vector<16x128xf32>
    %c22_176 = arith.constant 22 : index
    %c0_177 = arith.constant 0 : index
    %c0_178 = arith.constant 0 : index
    %329 = vector.load %arg2[%c22_176, %c0_177, %c0_178] : memref<45x16x128xf32, #tpu.memory_space<vmem>>, vector<1x16x128xf32>
    %330 = vector.shape_cast %329 : vector<1x16x128xf32> to vector<16x128xf32>
    %331 = arith.mulf %236, %330 : vector<16x128xf32>
    %332 = arith.addf %320, %331 : vector<16x128xf32>
    %c37_179 = arith.constant 37 : index
    %c0_180 = arith.constant 0 : index
    %c0_181 = arith.constant 0 : index
    %333 = vector.load %arg2[%c37_179, %c0_180, %c0_181] : memref<45x16x128xf32, #tpu.memory_space<vmem>>, vector<1x16x128xf32>
    %334 = vector.shape_cast %333 : vector<1x16x128xf32> to vector<16x128xf32>
    %335 = arith.mulf %236, %334 : vector<16x128xf32>
    %336 = arith.addf %324, %335 : vector<16x128xf32>
    %c127_i32_182 = arith.constant 127 : i32
    %337 = tpu.dynamic_rotate %236 by %c127_i32_182 dim 1 : vector<16x128xf32>, i32 -> vector<16x128xf32>
    %c8_183 = arith.constant 8 : index
    %c0_184 = arith.constant 0 : index
    %c0_185 = arith.constant 0 : index
    %338 = vector.load %arg2[%c8_183, %c0_184, %c0_185] : memref<45x16x128xf32, #tpu.memory_space<vmem>>, vector<1x16x128xf32>
    %339 = vector.shape_cast %338 : vector<1x16x128xf32> to vector<16x128xf32>
    %340 = arith.mulf %337, %339 : vector<16x128xf32>
    %341 = arith.addf %328, %340 : vector<16x128xf32>
    %c23_186 = arith.constant 23 : index
    %c0_187 = arith.constant 0 : index
    %c0_188 = arith.constant 0 : index
    %342 = vector.load %arg2[%c23_186, %c0_187, %c0_188] : memref<45x16x128xf32, #tpu.memory_space<vmem>>, vector<1x16x128xf32>
    %343 = vector.shape_cast %342 : vector<1x16x128xf32> to vector<16x128xf32>
    %344 = arith.mulf %337, %343 : vector<16x128xf32>
    %345 = arith.addf %332, %344 : vector<16x128xf32>
    %c38_189 = arith.constant 38 : index
    %c0_190 = arith.constant 0 : index
    %c0_191 = arith.constant 0 : index
    %346 = vector.load %arg2[%c38_189, %c0_190, %c0_191] : memref<45x16x128xf32, #tpu.memory_space<vmem>>, vector<1x16x128xf32>
    %347 = vector.shape_cast %346 : vector<1x16x128xf32> to vector<16x128xf32>
    %348 = arith.mulf %337, %347 : vector<16x128xf32>
    %349 = arith.addf %336, %348 : vector<16x128xf32>
    %c126_i32_192 = arith.constant 126 : i32
    %350 = tpu.dynamic_rotate %236 by %c126_i32_192 dim 1 : vector<16x128xf32>, i32 -> vector<16x128xf32>
    %c9_193 = arith.constant 9 : index
    %c0_194 = arith.constant 0 : index
    %c0_195 = arith.constant 0 : index
    %351 = vector.load %arg2[%c9_193, %c0_194, %c0_195] : memref<45x16x128xf32, #tpu.memory_space<vmem>>, vector<1x16x128xf32>
    %352 = vector.shape_cast %351 : vector<1x16x128xf32> to vector<16x128xf32>
    %353 = arith.mulf %350, %352 : vector<16x128xf32>
    %354 = arith.addf %341, %353 : vector<16x128xf32>
    %c24_196 = arith.constant 24 : index
    %c0_197 = arith.constant 0 : index
    %c0_198 = arith.constant 0 : index
    %355 = vector.load %arg2[%c24_196, %c0_197, %c0_198] : memref<45x16x128xf32, #tpu.memory_space<vmem>>, vector<1x16x128xf32>
    %356 = vector.shape_cast %355 : vector<1x16x128xf32> to vector<16x128xf32>
    %357 = arith.mulf %350, %356 : vector<16x128xf32>
    %358 = arith.addf %345, %357 : vector<16x128xf32>
    %c39_199 = arith.constant 39 : index
    %c0_200 = arith.constant 0 : index
    %c0_201 = arith.constant 0 : index
    %359 = vector.load %arg2[%c39_199, %c0_200, %c0_201] : memref<45x16x128xf32, #tpu.memory_space<vmem>>, vector<1x16x128xf32>
    %360 = vector.shape_cast %359 : vector<1x16x128xf32> to vector<16x128xf32>
    %361 = arith.mulf %350, %360 : vector<16x128xf32>
    %362 = arith.addf %349, %361 : vector<16x128xf32>
    %c125_i32_202 = arith.constant 125 : i32
    %363 = tpu.dynamic_rotate %236 by %c125_i32_202 dim 1 : vector<16x128xf32>, i32 -> vector<16x128xf32>
    %c10_203 = arith.constant 10 : index
    %c0_204 = arith.constant 0 : index
    %c0_205 = arith.constant 0 : index
    %364 = vector.load %arg2[%c10_203, %c0_204, %c0_205] : memref<45x16x128xf32, #tpu.memory_space<vmem>>, vector<1x16x128xf32>
    %365 = vector.shape_cast %364 : vector<1x16x128xf32> to vector<16x128xf32>
    %366 = arith.mulf %363, %365 : vector<16x128xf32>
    %367 = arith.addf %354, %366 : vector<16x128xf32>
    %c25_206 = arith.constant 25 : index
    %c0_207 = arith.constant 0 : index
    %c0_208 = arith.constant 0 : index
    %368 = vector.load %arg2[%c25_206, %c0_207, %c0_208] : memref<45x16x128xf32, #tpu.memory_space<vmem>>, vector<1x16x128xf32>
    %369 = vector.shape_cast %368 : vector<1x16x128xf32> to vector<16x128xf32>
    %370 = arith.mulf %363, %369 : vector<16x128xf32>
    %371 = arith.addf %358, %370 : vector<16x128xf32>
    %c40_209 = arith.constant 40 : index
    %c0_210 = arith.constant 0 : index
    %c0_211 = arith.constant 0 : index
    %372 = vector.load %arg2[%c40_209, %c0_210, %c0_211] : memref<45x16x128xf32, #tpu.memory_space<vmem>>, vector<1x16x128xf32>
    %373 = vector.shape_cast %372 : vector<1x16x128xf32> to vector<16x128xf32>
    %374 = arith.mulf %363, %373 : vector<16x128xf32>
    %375 = arith.addf %362, %374 : vector<16x128xf32>
    %c124_i32_212 = arith.constant 124 : i32
    %376 = tpu.dynamic_rotate %236 by %c124_i32_212 dim 1 : vector<16x128xf32>, i32 -> vector<16x128xf32>
    %c11_213 = arith.constant 11 : index
    %c0_214 = arith.constant 0 : index
    %c0_215 = arith.constant 0 : index
    %377 = vector.load %arg2[%c11_213, %c0_214, %c0_215] : memref<45x16x128xf32, #tpu.memory_space<vmem>>, vector<1x16x128xf32>
    %378 = vector.shape_cast %377 : vector<1x16x128xf32> to vector<16x128xf32>
    %379 = arith.mulf %376, %378 : vector<16x128xf32>
    %380 = arith.addf %367, %379 : vector<16x128xf32>
    %c26_216 = arith.constant 26 : index
    %c0_217 = arith.constant 0 : index
    %c0_218 = arith.constant 0 : index
    %381 = vector.load %arg2[%c26_216, %c0_217, %c0_218] : memref<45x16x128xf32, #tpu.memory_space<vmem>>, vector<1x16x128xf32>
    %382 = vector.shape_cast %381 : vector<1x16x128xf32> to vector<16x128xf32>
    %383 = arith.mulf %376, %382 : vector<16x128xf32>
    %384 = arith.addf %371, %383 : vector<16x128xf32>
    %c41_219 = arith.constant 41 : index
    %c0_220 = arith.constant 0 : index
    %c0_221 = arith.constant 0 : index
    %385 = vector.load %arg2[%c41_219, %c0_220, %c0_221] : memref<45x16x128xf32, #tpu.memory_space<vmem>>, vector<1x16x128xf32>
    %386 = vector.shape_cast %385 : vector<1x16x128xf32> to vector<16x128xf32>
    %387 = arith.mulf %376, %386 : vector<16x128xf32>
    %388 = arith.addf %375, %387 : vector<16x128xf32>
    %c123_i32_222 = arith.constant 123 : i32
    %389 = tpu.dynamic_rotate %236 by %c123_i32_222 dim 1 : vector<16x128xf32>, i32 -> vector<16x128xf32>
    %c12_223 = arith.constant 12 : index
    %c0_224 = arith.constant 0 : index
    %c0_225 = arith.constant 0 : index
    %390 = vector.load %arg2[%c12_223, %c0_224, %c0_225] : memref<45x16x128xf32, #tpu.memory_space<vmem>>, vector<1x16x128xf32>
    %391 = vector.shape_cast %390 : vector<1x16x128xf32> to vector<16x128xf32>
    %392 = arith.mulf %389, %391 : vector<16x128xf32>
    %393 = arith.addf %380, %392 : vector<16x128xf32>
    %c27_226 = arith.constant 27 : index
    %c0_227 = arith.constant 0 : index
    %c0_228 = arith.constant 0 : index
    %394 = vector.load %arg2[%c27_226, %c0_227, %c0_228] : memref<45x16x128xf32, #tpu.memory_space<vmem>>, vector<1x16x128xf32>
    %395 = vector.shape_cast %394 : vector<1x16x128xf32> to vector<16x128xf32>
    %396 = arith.mulf %389, %395 : vector<16x128xf32>
    %397 = arith.addf %384, %396 : vector<16x128xf32>
    %c42_229 = arith.constant 42 : index
    %c0_230 = arith.constant 0 : index
    %c0_231 = arith.constant 0 : index
    %398 = vector.load %arg2[%c42_229, %c0_230, %c0_231] : memref<45x16x128xf32, #tpu.memory_space<vmem>>, vector<1x16x128xf32>
    %399 = vector.shape_cast %398 : vector<1x16x128xf32> to vector<16x128xf32>
    %400 = arith.mulf %389, %399 : vector<16x128xf32>
    %401 = arith.addf %388, %400 : vector<16x128xf32>
    %c122_i32_232 = arith.constant 122 : i32
    %402 = tpu.dynamic_rotate %236 by %c122_i32_232 dim 1 : vector<16x128xf32>, i32 -> vector<16x128xf32>
    %c13_233 = arith.constant 13 : index
    %c0_234 = arith.constant 0 : index
    %c0_235 = arith.constant 0 : index
    %403 = vector.load %arg2[%c13_233, %c0_234, %c0_235] : memref<45x16x128xf32, #tpu.memory_space<vmem>>, vector<1x16x128xf32>
    %404 = vector.shape_cast %403 : vector<1x16x128xf32> to vector<16x128xf32>
    %405 = arith.mulf %402, %404 : vector<16x128xf32>
    %406 = arith.addf %393, %405 : vector<16x128xf32>
    %c28_236 = arith.constant 28 : index
    %c0_237 = arith.constant 0 : index
    %c0_238 = arith.constant 0 : index
    %407 = vector.load %arg2[%c28_236, %c0_237, %c0_238] : memref<45x16x128xf32, #tpu.memory_space<vmem>>, vector<1x16x128xf32>
    %408 = vector.shape_cast %407 : vector<1x16x128xf32> to vector<16x128xf32>
    %409 = arith.mulf %402, %408 : vector<16x128xf32>
    %410 = arith.addf %397, %409 : vector<16x128xf32>
    %c43_239 = arith.constant 43 : index
    %c0_240 = arith.constant 0 : index
    %c0_241 = arith.constant 0 : index
    %411 = vector.load %arg2[%c43_239, %c0_240, %c0_241] : memref<45x16x128xf32, #tpu.memory_space<vmem>>, vector<1x16x128xf32>
    %412 = vector.shape_cast %411 : vector<1x16x128xf32> to vector<16x128xf32>
    %413 = arith.mulf %402, %412 : vector<16x128xf32>
    %414 = arith.addf %401, %413 : vector<16x128xf32>
    %c121_i32_242 = arith.constant 121 : i32
    %415 = tpu.dynamic_rotate %236 by %c121_i32_242 dim 1 : vector<16x128xf32>, i32 -> vector<16x128xf32>
    %c14_243 = arith.constant 14 : index
    %c0_244 = arith.constant 0 : index
    %c0_245 = arith.constant 0 : index
    %416 = vector.load %arg2[%c14_243, %c0_244, %c0_245] : memref<45x16x128xf32, #tpu.memory_space<vmem>>, vector<1x16x128xf32>
    %417 = vector.shape_cast %416 : vector<1x16x128xf32> to vector<16x128xf32>
    %418 = arith.mulf %415, %417 : vector<16x128xf32>
    %419 = arith.addf %406, %418 : vector<16x128xf32>
    %c29_246 = arith.constant 29 : index
    %c0_247 = arith.constant 0 : index
    %c0_248 = arith.constant 0 : index
    %420 = vector.load %arg2[%c29_246, %c0_247, %c0_248] : memref<45x16x128xf32, #tpu.memory_space<vmem>>, vector<1x16x128xf32>
    %421 = vector.shape_cast %420 : vector<1x16x128xf32> to vector<16x128xf32>
    %422 = arith.mulf %415, %421 : vector<16x128xf32>
    %423 = arith.addf %410, %422 : vector<16x128xf32>
    %c44_249 = arith.constant 44 : index
    %c0_250 = arith.constant 0 : index
    %c0_251 = arith.constant 0 : index
    %424 = vector.load %arg2[%c44_249, %c0_250, %c0_251] : memref<45x16x128xf32, #tpu.memory_space<vmem>>, vector<1x16x128xf32>
    %425 = vector.shape_cast %424 : vector<1x16x128xf32> to vector<16x128xf32>
    %426 = arith.mulf %415, %425 : vector<16x128xf32>
    %427 = arith.addf %414, %426 : vector<16x128xf32>
    %cst_252 = arith.constant 0.000000e+00 : f32
    %428 = vector.broadcast %cst_252 : f32 to vector<1x128xf32>
    %429 = vector.extract_strided_slice %419 {offsets = [0, 0], sizes = [15, 128], strides = [1, 1]} : vector<16x128xf32> to vector<15x128xf32>
    %430 = tpu.concatenate %428, %429 in 0 : vector<1x128xf32>, vector<15x128xf32> -> vector<16x128xf32>
    %431 = vector.extract_strided_slice %427 {offsets = [1, 0], sizes = [15, 128], strides = [1, 1]} : vector<16x128xf32> to vector<15x128xf32>
    %432 = tpu.concatenate %431, %428 in 0 : vector<15x128xf32>, vector<1x128xf32> -> vector<16x128xf32>
    %433 = arith.addf %430, %423 : vector<16x128xf32>
    %434 = arith.addf %433, %432 : vector<16x128xf32>
    %c2_253 = arith.constant 2 : index
    %c0_254 = arith.constant 0 : index
    %435 = vector.load %arg3[%c2_253, %c0_254] : memref<4x128xf32, #tpu.memory_space<vmem>>, vector<1x128xf32>
    %c3_255 = arith.constant 3 : index
    %c0_256 = arith.constant 0 : index
    %436 = vector.load %arg3[%c3_255, %c0_256] : memref<4x128xf32, #tpu.memory_space<vmem>>, vector<1x128xf32>
    %cst_257 = arith.constant dense<0.000000e+00> : vector<128xf32>
    %437 = vector.multi_reduction <add>, %434, %cst_257 [0] : vector<16x128xf32> to vector<128xf32>
    %438 = vector.shape_cast %437 : vector<128xf32> to vector<1x128xf32>
    %439 = arith.mulf %434, %434 : vector<16x128xf32>
    %cst_258 = arith.constant dense<0.000000e+00> : vector<128xf32>
    %440 = vector.multi_reduction <add>, %439, %cst_258 [0] : vector<16x128xf32> to vector<128xf32>
    %441 = vector.shape_cast %440 : vector<128xf32> to vector<1x128xf32>
    %442 = tpu.concatenate %438, %441 in 0 : vector<1x128xf32>, vector<1x128xf32> -> vector<2x128xf32>
    %c4_i32_259 = arith.constant 4 : i32
    %443 = tpu.dynamic_rotate %442 by %c4_i32_259 dim 1 : vector<2x128xf32>, i32 -> vector<2x128xf32>
    %444 = arith.addf %442, %443 : vector<2x128xf32>
    %c8_i32_260 = arith.constant 8 : i32
    %445 = tpu.dynamic_rotate %444 by %c8_i32_260 dim 1 : vector<2x128xf32>, i32 -> vector<2x128xf32>
    %446 = arith.addf %444, %445 : vector<2x128xf32>
    %c16_i32_261 = arith.constant 16 : i32
    %447 = tpu.dynamic_rotate %446 by %c16_i32_261 dim 1 : vector<2x128xf32>, i32 -> vector<2x128xf32>
    %448 = arith.addf %446, %447 : vector<2x128xf32>
    %c32_i32_262 = arith.constant 32 : i32
    %449 = tpu.dynamic_rotate %448 by %c32_i32_262 dim 1 : vector<2x128xf32>, i32 -> vector<2x128xf32>
    %450 = arith.addf %448, %449 : vector<2x128xf32>
    %c64_i32_263 = arith.constant 64 : i32
    %451 = tpu.dynamic_rotate %450 by %c64_i32_263 dim 1 : vector<2x128xf32>, i32 -> vector<2x128xf32>
    %452 = arith.addf %450, %451 : vector<2x128xf32>
    %453 = vector.extract_strided_slice %452 {offsets = [0, 0], sizes = [1, 128], strides = [1, 1]} : vector<2x128xf32> to vector<1x128xf32>
    %cst_264 = arith.constant 0.001953125 : f32
    %454 = vector.broadcast %cst_264 : f32 to vector<1x128xf32>
    %455 = arith.mulf %453, %454 : vector<1x128xf32>
    %456 = vector.extract_strided_slice %452 {offsets = [1, 0], sizes = [1, 128], strides = [1, 1]} : vector<2x128xf32> to vector<1x128xf32>
    %cst_265 = arith.constant 0.001953125 : f32
    %457 = vector.broadcast %cst_265 : f32 to vector<1x128xf32>
    %458 = arith.mulf %456, %457 : vector<1x128xf32>
    %459 = arith.mulf %455, %455 : vector<1x128xf32>
    %460 = arith.subf %458, %459 : vector<1x128xf32>
    %cst_266 = arith.constant 9.99999974E-6 : f32
    %461 = vector.broadcast %cst_266 : f32 to vector<1x128xf32>
    %462 = arith.addf %460, %461 : vector<1x128xf32>
    %463 = math.rsqrt %462 : vector<1x128xf32>
    %464 = arith.mulf %435, %463 : vector<1x128xf32>
    %465 = arith.mulf %455, %464 : vector<1x128xf32>
    %466 = arith.subf %436, %465 : vector<1x128xf32>
    %467 = vector.broadcast %464 : vector<1x128xf32> to vector<16x128xf32>
    %468 = arith.mulf %434, %467 : vector<16x128xf32>
    %469 = vector.broadcast %466 : vector<1x128xf32> to vector<16x128xf32>
    %470 = arith.addf %468, %469 : vector<16x128xf32>
    %471 = arith.addf %470, %0 : vector<16x128xf32>
    %cst_267 = arith.constant 0.000000e+00 : f32
    %472 = vector.broadcast %cst_267 : f32 to vector<16x128xf32>
    %473 = arith.maximumf %471, %472 : vector<16x128xf32>
    %c0_268 = arith.constant 0 : index
    %c0_269 = arith.constant 0 : index
    %474 = vector.load %arg4[%c0_268, %c0_269] : memref<16x128xf32, #tpu.memory_space<vmem>>, vector<16x128xf32>
    tpu.vector_store %arg4[%c0_268, %c0_269], %473 {strides = array<i32>} : memref<16x128xf32, #tpu.memory_space<vmem>>, vector<16x128xf32>,
    return
  }
}

</mosaic_0001>

<bundles_post_ra>
// kernel: tile.55
= control target key start
LH: loop header
LB: loop body
LE: loop exit
PB: predicated region body
PF: predicated region fallthrough
CT: control target
= control target key end

     0   :  { %s40_s0 = inlined_call_operand.vmem [shape: f32[4], index: 0, kind: input, shape index: {}]   ;;  %s41_s1 = inlined_call_operand.vmem [shape: f32[32,4], index: 1, kind: output, shape index: {}]  }
   0x1   :  { %v4_v0 = vld [vmem:[%s40_s0] ss:$0 sm:$0xff] }
   0x2   :  { %5 = vst [vmem:[%s41_s1] sm:$0xff] %v4_v0  ;;  %12 = vst [vmem:[%s41_s1 + $0x8] sm:$0xff] %v4_v0 }
   0x3   :  { %13 = vst [vmem:[%s41_s1 + $0x10] sm:$0xff] %v4_v0  ;;  %14 = vst [vmem:[%s41_s1 + $0x18] sm:$0xff] %v4_v0 }

// kernel: tile.59
= control target key start
LH: loop header
LB: loop body
LE: loop exit
PB: predicated region body
PF: predicated region fallthrough
CT: control target
= control target key end

     0   :  { %s261_s10 = smov 124   ;;  %s262_s11 = smov 116   ;;  %vm3_vm0 = vcmask 31744   ;;  %vm9_vm1 = vcmask 1048544   ;;  %vm15_vm2 = vcmask 1015744   ;;  %vm21_vm3 = vcmask 982944   ;;  %s401_s0 = inlined_call_operand.vmem [shape: f32[32,4], index: 0, kind: input, shape index: {}]   ;;  %s402_s1 = inlined_call_operand.vmem [shape: f32[1,128], index: 1, kind: output, shape index: {}]  }
   0x1   :  { %v199_v0 = vld [vmem:[%s401_s0 + $0x1f] sm:$0x1]   ;;  %v201_v1 = vld [vmem:[%s401_s0 + $0x1d] sm:$0x1]   ;;  %v200_v2 = vld [vmem:[%s401_s0 + $0x1e] sm:$0x1]  }
   0x2   :  { %7 = vrot.lane.b32.xlu0 %v199_v0, %s261_s10  ;;  %19 = vrot.lane.b32.xlu1 %v201_v1, %s262_s11  ;;  %v202_v3 = vld [vmem:[%s401_s0 + $0x1c] sm:$0x1]   ;;  %s263_s16 = smov 120   ;;  %s264_s17 = smov 112   ;;  %v203_v4 = vld [vmem:[%s401_s0 + $0x1b] sm:$0x1]  }
   0x3   :  { %v204_v5 = vld [vmem:[%s401_s0 + $0x1a] sm:$0x1]   ;;  %s265_s22 = smov 108   ;;  %s266_s23 = smov 104   ;;  %v205_v6 = vld [vmem:[%s401_s0 + $0x19] sm:$0x1]  }
   0x4   :  { %v206_v7 = vld [vmem:[%s401_s0 + $0x18] sm:$0x1]   ;;  %s267_s28 = smov 100   ;;  %s268_s29 = smov 96   ;;  %v207_v8 = vld [vmem:[%s401_s0 + $0x17] sm:$0x1]  }
   0x5   :  { %v208_v9 = vld [vmem:[%s401_s0 + $0x16] sm:$0x1]   ;;  %v2_v10 = vld [vmem:[%s401_s0] sm:$0x1]   ;;  %s269_s7 = smov 92   ;;  %s270_s8 = smov 88  }
   0x6   :  { %13 = vrot.lane.b32.xlu0 %v200_v2, %s263_s16  ;;  %25 = vrot.lane.b32.xlu1 %v202_v3, %s264_s17  ;;  %4 = vst.msk [vmem:[#allocation0] sm:$0x1] %vm3_vm0, %v2_v10   ;;  %v209_v11 = vld [vmem:[%s401_s0 + $0x15] sm:$0x1]   ;;  %v210_v12 = vld [vmem:[%s401_s0 + $0x14] sm:$0x1]  }
   0x7   :  { %s271_s13 = smov 84   ;;  %s272_s14 = smov 80   ;;  %v211_v13 = vld [vmem:[%s401_s0 + $0x13] sm:$0x1]   ;;  %v212_v14 = vld [vmem:[%s401_s0 + $0x12] sm:$0x1]  }
   0x8   :  { %s273_s19 = smov 76   ;;  %s274_s20 = smov 72   ;;  %v213_v15 = vld [vmem:[%s401_s0 + $0x11] sm:$0x1]   ;;  %v214_v16 = vld [vmem:[%s401_s0 + $0x10] sm:$0x1]  }
   0x9   :  { %s275_s25 = smov 68   ;;  %s276_s26 = smov 64   ;;  %v215_v17 = vld [vmem:[%s401_s0 + $0xf] sm:$0x1]   ;;  %v216_v18 = vld [vmem:[%s401_s0 + $0xe] sm:$0x1]  }
   0xa   :  { %31 = vrot.lane.b32.xlu0 %v203_v4, %s265_s22  ;;  %37 = vrot.lane.b32.xlu1 %v204_v5, %s266_s23  ;;  %s277_s2 = smov 60   ;;  %s278_s3 = smov 56   ;;  %v217_v19 = vld [vmem:[%s401_s0 + $0xd] sm:$0x1]   ;;  %v218_v20 = vld [vmem:[%s401_s0 + $0xc] sm:$0x1]  }
   0xb   :  { %s280_s9 = smov 48   ;;  %v219_v21 = vld [vmem:[%s401_s0 + $0xb] sm:$0x1]   ;;  %v220_v22 = vld [vmem:[%s401_s0 + $0xa] sm:$0x1]   ;;  %s282_s15 = smov 40  }
   0xc   :  { %v221_v23 = vld [vmem:[%s401_s0 + $0x9] sm:$0x1]   ;;  %v222_v24 = vld [vmem:[%s401_s0 + $0x8] sm:$0x1]   ;;  %s284_s21 = smov 32   ;;  %s286_s27 = smov 24  }
   0xd   :  { %v223_v25 = vld [vmem:[%s401_s0 + $0x7] sm:$0x1]   ;;  %v224_v26 = vld [vmem:[%s401_s0 + $0x6] sm:$0x1]   ;;  %v225_v27 = vld [vmem:[%s401_s0 + $0x5] sm:$0x1]  }
   0xe   :  { %43 = vrot.lane.b32.xlu0 %v205_v6, %s267_s28  ;;  %49 = vrot.lane.b32.xlu1 %v206_v7, %s268_s29  ;;  %v226_v28 = vld [vmem:[%s401_s0 + $0x4] sm:$0x1]   ;;  %s288_s4 = smov 16   ;;  %v227_v29 = vld [vmem:[%s401_s0 + $0x3] sm:$0x1]   ;;  %s290_s10 = smov 8  }
   0xf   :  { %v228_v30 = vld [vmem:[%s401_s0 + $0x2] sm:$0x1]   ;;  %v229_v31 = vld [vmem:[%s401_s0 + $0x1] sm:$0x1]   ;;  %s291_s0 = smov 4   ;;  %vm27_vm4 = vcmask 950144  }
  0x10   :  { %vm33_vm5 = vcmask 917344   ;;  %vm39_vm6 = vcmask 884544   ;;  %vm45_vm7 = vcmask 851744   ;;  %vm51_vm8 = vcmask 818944  }
  0x11   :  { %vm57_vm9 = vcmask 786144   ;;  %vm63_vm10 = vcmask 753344   ;;  %vm69_vm11 = vcmask 720544   ;;  %vm75_vm12 = vcmask 687744  }
  0x12   :  { %55 = vrot.lane.b32.xlu0 %v207_v8, %s269_s7  ;;  %61 = vrot.lane.b32.xlu1 %v208_v9, %s270_s8  ;;  %s279_s8 = smov 52   ;;  %vm81_vm13 = vcmask 654944   ;;  %vm87_vm14 = vcmask 622144   ;;  %vm93_vm15 = vcmask 589344   ;;  %vm99_vm0 = vcmask 556544  }
  0x16   :  { %67 = vrot.lane.b32.xlu0 %v209_v11, %s271_s13  ;;  %73 = vrot.lane.b32.xlu1 %v210_v12, %s272_s14  ;;  %s281_s14 = smov 44  }
  0x1a   :  { %79 = vrot.lane.b32.xlu0 %v211_v13, %s273_s19  ;;  %85 = vrot.lane.b32.xlu1 %v212_v14, %s274_s20  ;;  %s283_s20 = smov 36  }
  0x1e   :  { %91 = vrot.lane.b32.xlu0 %v213_v15, %s275_s25  ;;  %97 = vrot.lane.b32.xlu1 %v214_v16, %s276_s26  ;;  %s285_s26 = smov 28  }
  0x22   :  { %103 = vrot.lane.b32.xlu0 %v215_v17, %s277_s2  ;;  %109 = vrot.lane.b32.xlu1 %v216_v18, %s278_s3  ;;  %s287_s3 = smov 20  }
  0x26   :  { %115 = vrot.lane.b32.xlu0 %v217_v19, %s279_s8  ;;  %121 = vrot.lane.b32.xlu1 %v218_v20, %s280_s9  ;;  %s289_s9 = smov 12  }
  0x2a   :  { %127 = vrot.lane.b32.xlu0 %v219_v21, %s281_s14  ;;  %133 = vrot.lane.b32.xlu1 %v220_v22, %s282_s15 }
  0x2e   :  { %139 = vrot.lane.b32.xlu0 %v221_v23, %s283_s20  ;;  %145 = vrot.lane.b32.xlu1 %v222_v24, %s284_s21 }
  0x32   :  { %151 = vrot.lane.b32.xlu0 %v223_v25, %s285_s26  ;;  %157 = vrot.lane.b32.xlu1 %v224_v26, %s286_s27 }
  0x36   :  { %163 = vrot.lane.b32.xlu0 %v225_v27, %s287_s3  ;;  %169 = vrot.lane.b32.xlu1 %v226_v28, %s288_s4 }
  0x3a   :  { %175 = vrot.lane.b32.xlu0 %v227_v29, %s289_s9  ;;  %181 = vrot.lane.b32.xlu1 %v228_v30, %s290_s10 }
  0x3e   :  { %187 = vrot.lane.b32.xlu0 %v229_v31, %s291_s0 }
  0x74   :  { %v8_v32 = vpop.permute.xlu0 %7   ;;  %v20_v33 = vpop.permute.xlu1 %19  }
  0x75   :  { %10 = vst.msk [vmem:[#allocation0] sm:$0x1] %vm9_vm1, %v8_v32   ;;  %vm105_vm1 = vcmask 523744  }
  0x78   :  { %v14_v34 = vpop.permute.xlu0 %13   ;;  %v26_v35 = vpop.permute.xlu1 %25  }
  0x79   :  { %16 = vst.msk [vmem:[#allocation0] sm:$0x1] %vm15_vm2, %v14_v34   ;;  %vm111_vm2 = vcmask 490944  }
  0x7a   :  { %22 = vst.msk [vmem:[#allocation0] sm:$0x1] %vm21_vm3, %v20_v33   ;;  %vm117_vm3 = vcmask 458144  }
  0x7b   :  { %28 = vst.msk [vmem:[#allocation0] sm:$0x1] %vm27_vm4, %v26_v35   ;;  %vm123_vm4 = vcmask 425344  }
  0x7c   :  { %v32_v36 = vpop.permute.xlu0 %31   ;;  %v38_v37 = vpop.permute.xlu1 %37  }
  0x7d   :  { %34 = vst.msk [vmem:[#allocation0] sm:$0x1] %vm33_vm5, %v32_v36   ;;  %vm129_vm5 = vcmask 392544  }
  0x7e   :  { %40 = vst.msk [vmem:[#allocation0] sm:$0x1] %vm39_vm6, %v38_v37   ;;  %vm135_vm6 = vcmask 359744  }
  0x80   :  { %v44_v38 = vpop.permute.xlu0 %43   ;;  %v50_v39 = vpop.permute.xlu1 %49  }
  0x81   :  { %46 = vst.msk [vmem:[#allocation0] sm:$0x1] %vm45_vm7, %v44_v38   ;;  %vm141_vm7 = vcmask 326944  }
  0x82   :  { %52 = vst.msk [vmem:[#allocation0] sm:$0x1] %vm51_vm8, %v50_v39   ;;  %vm147_vm8 = vcmask 294144  }
  0x84   :  { %v56_v40 = vpop.permute.xlu0 %55   ;;  %v62_v41 = vpop.permute.xlu1 %61  }
  0x85   :  { %58 = vst.msk [vmem:[#allocation0] sm:$0x1] %vm57_vm9, %v56_v40   ;;  %vm153_vm9 = vcmask 261344  }
  0x86   :  { %64 = vst.msk [vmem:[#allocation0] sm:$0x1] %vm63_vm10, %v62_v41   ;;  %vm159_vm10 = vcmask 228544  }
  0x88   :  { %v68_v42 = vpop.permute.xlu0 %67   ;;  %v74_v43 = vpop.permute.xlu1 %73  }
  0x89   :  { %70 = vst.msk [vmem:[#allocation0] sm:$0x1] %vm69_vm11, %v68_v42   ;;  %vm165_vm11 = vcmask 195744  }
  0x8a   :  { %76 = vst.msk [vmem:[#allocation0] sm:$0x1] %vm75_vm12, %v74_v43   ;;  %vm171_vm12 = vcmask 162944  }
  0x8c   :  { %v80_v44 = vpop.permute.xlu0 %79   ;;  %v86_v45 = vpop.permute.xlu1 %85  }
  0x8d   :  { %82 = vst.msk [vmem:[#allocation0] sm:$0x1] %vm81_vm13, %v80_v44   ;;  %vm177_vm13 = vcmask 130144  }
  0x8e   :  { %88 = vst.msk [vmem:[#allocation0] sm:$0x1] %vm87_vm14, %v86_v45   ;;  %vm183_vm14 = vcmask 97344  }
  0x90   :  { %v92_v46 = vpop.permute.xlu0 %91   ;;  %v98_v47 = vpop.permute.xlu1 %97  }
  0x91   :  { %94 = vst.msk [vmem:[#allocation0] sm:$0x1] %vm93_vm15, %v92_v46   ;;  %vm189_vm15 = vcmask 64544  }
  0x92   :  { %100 = vst.msk [vmem:[#allocation0] sm:$0x1] %vm99_vm0, %v98_v47  }
  0x94   :  { %v104_v48 = vpop.permute.xlu0 %103   ;;  %v110_v49 = vpop.permute.xlu1 %109  }
  0x95   :  { %106 = vst.msk [vmem:[#allocation0] sm:$0x1] %vm105_vm1, %v104_v48  }
  0x96   :  { %112 = vst.msk [vmem:[#allocation0] sm:$0x1] %vm111_vm2, %v110_v49  }
  0x98   :  { %v116_v50 = vpop.permute.xlu0 %115   ;;  %v122_v51 = vpop.permute.xlu1 %121  }
  0x99   :  { %118 = vst.msk [vmem:[#allocation0] sm:$0x1] %vm117_vm3, %v116_v50  }
  0x9a   :  { %124 = vst.msk [vmem:[#allocation0] sm:$0x1] %vm123_vm4, %v122_v51  }
  0x9c   :  { %v128_v52 = vpop.permute.xlu0 %127   ;;  %v134_v53 = vpop.permute.xlu1 %133  }
  0x9d   :  { %130 = vst.msk [vmem:[#allocation0] sm:$0x1] %vm129_vm5, %v128_v52  }
  0x9e   :  { %136 = vst.msk [vmem:[#allocation0] sm:$0x1] %vm135_vm6, %v134_v53  }
  0xa0   :  { %v140_v54 = vpop.permute.xlu0 %139   ;;  %v146_v55 = vpop.permute.xlu1 %145  }
  0xa1   :  { %142 = vst.msk [vmem:[#allocation0] sm:$0x1] %vm141_vm7, %v140_v54  }
  0xa2   :  { %148 = vst.msk [vmem:[#allocation0] sm:$0x1] %vm147_vm8, %v146_v55  }
  0xa4   :  { %v152_v56 = vpop.permute.xlu0 %151   ;;  %v158_v57 = vpop.permute.xlu1 %157  }
  0xa5   :  { %154 = vst.msk [vmem:[#allocation0] sm:$0x1] %vm153_vm9, %v152_v56  }
  0xa6   :  { %160 = vst.msk [vmem:[#allocation0] sm:$0x1] %vm159_vm10, %v158_v57  }
  0xa8   :  { %v164_v58 = vpop.permute.xlu0 %163   ;;  %v170_v59 = vpop.permute.xlu1 %169  }
  0xa9   :  { %166 = vst.msk [vmem:[#allocation0] sm:$0x1] %vm165_vm11, %v164_v58  }
  0xaa   :  { %172 = vst.msk [vmem:[#allocation0] sm:$0x1] %vm171_vm12, %v170_v59  }
  0xac   :  { %v176_v60 = vpop.permute.xlu0 %175   ;;  %v182_v61 = vpop.permute.xlu1 %181  }
  0xad   :  { %178 = vst.msk [vmem:[#allocation0] sm:$0x1] %vm177_vm13, %v176_v60  }
  0xae   :  { %184 = vst.msk [vmem:[#allocation0] sm:$0x1] %vm183_vm14, %v182_v61  }
  0xb0   :  { %v188_v62 = vpop.permute.xlu0 %187  }
  0xb1   :  { %190 = vst.msk [vmem:[#allocation0] sm:$0x1] %vm189_vm15, %v188_v62  }
  0xb8   :  { %v195_v63 = vld [vmem:[#allocation0] sm:$0x1] }
  0xb9   :  { %198 = vst [vmem:[%s402_s1] sm:$0x1] %v195_v63 }

// kernel: residual_block.1
= control target key start
LH: loop header
LB: loop body
LE: loop exit
PB: predicated region body
PF: predicated region fallthrough
CT: control target
= control target key end

     0   :  { %s1121_s17 = smov 6   ;;  %s1122_s18 = smov 7   ;;  %vm385_vm0 = vcmask 1040384   ;;  %vm394_vm1 = vcmask 1046528   ;;  %s1895_s0 = inlined_call_operand.vmem [shape: f32[16,128], index: 0, kind: input, shape index: {}, may-alias: {0,4}]   ;;  %s1896_s1 = inlined_call_operand.vmem [shape: f32[45,16,128], index: 1, kind: input, shape index: {}]   ;;  %s1897_s3 = inlined_call_operand.vmem [shape: f32[4,128], index: 3, kind: input, shape index: {}]   ;;  %s1898_s2 = inlined_call_operand.vmem [shape: f32[45,16,128], index: 2, kind: input, shape index: {}]   ;;  %s1899_s4 = inlined_call_operand.vmem [shape: f32[16,128], index: 4, kind: output, shape index: {}, may-alias: {0,4}]  }
   0x1   :  { %v1167_v0 = vld [vmem:[%s1895_s0] sm:$0xff]  ;;  %v1176_v1 = vld [vmem:[%s1895_s0 + $0x8] sm:$0xff]  ;;  %s1123_s21 = smov 5   ;;  %s1124_s22 = smov 4   ;;  %v925_v6 = vld [vmem:[%s1896_s1 + $0x10] sm:$0xff] }
   0x2   :  { %37 = vrot.lane.b32.xlu1 %v1167_v0, %s1121_s17  ;;  %19 = vrot.lane.b32.xlu0 %v1167_v0, %s1122_s18  ;;  %s1125_s23 = smov 3   ;;  %s1126_s24 = smov 2   ;;  %v927_v7 = vld [vmem:[%s1896_s1 + $0x100] sm:$0xff]  ;;  %v929_v8 = vld [vmem:[%s1896_s1 + $0x1f0] sm:$0xff] }
   0x3   :  { %s1127_s25 = smov 1   ;;  %s1128_s26 = smov 127   ;;  %v23_v9 = vld [vmem:[%s1896_s1] sm:$0xff]  ;;  %v921_v10 = vld [vmem:[%s1896_s1 + $0xf0] sm:$0xff]  ;;  %v926_v12 = vld [vmem:[%s1896_s1 + $0x18] sm:$0xff] }
   0x4   :  { %s1129_s27 = smov 126   ;;  %s1130_s28 = smov 125   ;;  %v923_v11 = vld [vmem:[%s1896_s1 + $0x1e0] sm:$0xff]  ;;  %v928_v13 = vld [vmem:[%s1896_s1 + $0x108] sm:$0xff]  ;;  %v930_v17 = vld [vmem:[%s1896_s1 + $0x1f8] sm:$0xff] }
   0x5   :  { %s1131_s29 = smov 124   ;;  %s1132_s30 = smov 123   ;;  %v24_v14 = vld [vmem:[%s1896_s1 + $0x8] sm:$0xff]  ;;  %v922_v18 = vld [vmem:[%s1896_s1 + $0xf8] sm:$0xff]  ;;  %v931_v38 = vld [vmem:[%s1896_s1 + $0x20] sm:$0xff] }
   0x6   :  { %39 = vrot.lane.b32.xlu1 %v1176_v1, %s1121_s17  ;;  %21 = vrot.lane.b32.xlu0 %v1176_v1, %s1122_s18  ;;  %s1133_s5 = smov 122   ;;  %s1134_s6 = smov 121   ;;  %v924_v19 = vld [vmem:[%s1896_s1 + $0x1e8] sm:$0xff]  ;;  %v934_v29 = vld [vmem:[%s1896_s1 + $0x118] sm:$0xff] }
   0x7   :  { %v932_v28 = vld [vmem:[%s1896_s1 + $0x28] sm:$0xff]  ;;  %v962_v30 = vld [vmem:[%s1896_s1 + $0x78] sm:$0xff]  ;;  %v933_v39 = vld [vmem:[%s1896_s1 + $0x110] sm:$0xff]  ;;  %s1136_s7 = smov 16   ;;  %s1137_s8 = smov 32  }
   0x8   :  { %v936_v35 = vld [vmem:[%s1896_s1 + $0x208] sm:$0xff]  ;;  %v935_v40 = vld [vmem:[%s1896_s1 + $0x200] sm:$0xff]  ;;  %v938_v44 = vld [vmem:[%s1896_s1 + $0x38] sm:$0xff]  ;;  %v1297_v47 = vmul.f32 %v962_v30, %v1176_v1  ;;  %s1138_s9 = smov 64  }
   0x9   :  { %v940_v45 = vld [vmem:[%s1896_s1 + $0x128] sm:$0xff]  ;;  %v942_v46 = vld [vmem:[%s1896_s1 + $0x218] sm:$0xff]  ;;  %v937_v52 = vld [vmem:[%s1896_s1 + $0x30] sm:$0xff] }
   0xa   :  { %64 = vrot.lane.b32.xlu1 %v1176_v1, %s1123_s21  ;;  %62 = vrot.lane.b32.xlu0 %v1167_v0, %s1123_s21  ;;  %v939_v53 = vld [vmem:[%s1896_s1 + $0x120] sm:$0xff]  ;;  %v941_v58 = vld [vmem:[%s1896_s1 + $0x210] sm:$0xff] }
   0xb   :  { %v944_v59 = vld [vmem:[%s1896_s1 + $0x48] sm:$0xff]  ;;  %v946_v60 = vld [vmem:[%s1896_s1 + $0x138] sm:$0xff]  ;;  %v949_v30 = vld [vmem:[%s1896_s1 + $0x50] sm:$0xff] }
   0xe   :  { %89 = vrot.lane.b32.xlu1 %v1176_v1, %s1124_s22  ;;  %87 = vrot.lane.b32.xlu0 %v1167_v0, %s1124_s22 }
  0x12   :  { %114 = vrot.lane.b32.xlu1 %v1176_v1, %s1125_s23  ;;  %112 = vrot.lane.b32.xlu0 %v1167_v0, %s1125_s23 }
  0x16   :  { %139 = vrot.lane.b32.xlu1 %v1176_v1, %s1126_s24  ;;  %137 = vrot.lane.b32.xlu0 %v1167_v0, %s1126_s24 }
  0x1a   :  { %164 = vrot.lane.b32.xlu1 %v1176_v1, %s1127_s25  ;;  %162 = vrot.lane.b32.xlu0 %v1167_v0, %s1127_s25 }
  0x1e   :  { %210 = vrot.lane.b32.xlu1 %v1176_v1, %s1128_s26  ;;  %208 = vrot.lane.b32.xlu0 %v1167_v0, %s1128_s26 }
  0x22   :  { %235 = vrot.lane.b32.xlu1 %v1176_v1, %s1129_s27  ;;  %233 = vrot.lane.b32.xlu0 %v1167_v0, %s1129_s27 }
  0x26   :  { %260 = vrot.lane.b32.xlu1 %v1176_v1, %s1130_s28  ;;  %258 = vrot.lane.b32.xlu0 %v1167_v0, %s1130_s28 }
  0x2a   :  { %285 = vrot.lane.b32.xlu1 %v1176_v1, %s1131_s29  ;;  %283 = vrot.lane.b32.xlu0 %v1167_v0, %s1131_s29 }
  0x2e   :  { %310 = vrot.lane.b32.xlu1 %v1176_v1, %s1132_s30  ;;  %308 = vrot.lane.b32.xlu0 %v1167_v0, %s1132_s30 }
  0x32   :  { %335 = vrot.lane.b32.xlu1 %v1176_v1, %s1133_s5  ;;  %333 = vrot.lane.b32.xlu0 %v1167_v0, %s1133_s5 }
  0x36   :  { %360 = vrot.lane.b32.xlu1 %v1176_v1, %s1134_s6  ;;  %358 = vrot.lane.b32.xlu0 %v1167_v0, %s1134_s6 }
  0x74   :  { %v38_v2 = vpop.permute.xlu1 %37  ;;  %v20_v3 = vpop.permute.xlu0 %19 }
  0x75   :  { %v44_v20 = vmul.f32 %v925_v6, %v38_v2  ;;  %v51_v21 = vmul.f32 %v927_v7, %v38_v2  ;;  %v58_v22 = vmul.f32 %v929_v8, %v38_v2  ;;  %v25_v23 = vmul.f32 %v23_v9, %v20_v3  ;;  %v943_v6 = vld [vmem:[%s1896_s1 + $0x40] sm:$0xff] }
  0x76   :  { %v30_v24 = vmul.f32 %v921_v10, %v20_v3  ;;  %v35_v25 = vmul.f32 %v923_v11, %v20_v3 }
  0x77   :  { %v46_v41 = vadd.f32 %v44_v20, %v25_v23 }
  0x78   :  { %v40_v4 = vpop.permute.xlu1 %39  ;;  %v22_v5 = vpop.permute.xlu0 %21  ;;  %v53_v48 = vadd.f32 %v51_v21, %v30_v24  ;;  %v60_v49 = vadd.f32 %v58_v22, %v35_v25  ;;  %v950_v21 = vld [vmem:[%s1896_s1 + $0x58] sm:$0xff] }
  0x79   :  { %v45_v26 = vmul.f32 %v926_v12, %v40_v4  ;;  %v26_v27 = vmul.f32 %v24_v14, %v22_v5  ;;  %v52_v31 = vmul.f32 %v928_v13, %v40_v4  ;;  %v59_v32 = vmul.f32 %v930_v17, %v40_v4 }
  0x7a   :  { %v31_v33 = vmul.f32 %v922_v18, %v22_v5  ;;  %v36_v34 = vmul.f32 %v924_v19, %v22_v5  ;;  %v948_v5 = vld [vmem:[%s1896_s1 + $0x228] sm:$0xff] }
  0x7b   :  { %v47_v50 = vadd.f32 %v45_v26, %v26_v27 }
  0x7c   :  { %v65_v15 = vpop.permute.xlu1 %64  ;;  %v63_v16 = vpop.permute.xlu0 %62  ;;  %v54_v54 = vadd.f32 %v52_v31, %v31_v33  ;;  %v61_v55 = vadd.f32 %v59_v32, %v36_v34 }
  0x7d   :  { %v70_v42 = vmul.f32 %v932_v28, %v65_v15  ;;  %v77_v43 = vmul.f32 %v934_v29, %v65_v15  ;;  %v84_v51 = vmul.f32 %v936_v35, %v65_v15  ;;  %v69_v56 = vmul.f32 %v931_v38, %v63_v16  ;;  %v945_v15 = vld [vmem:[%s1896_s1 + $0x130] sm:$0xff]  ;;  %v952_v28 = vld [vmem:[%s1896_s1 + $0x148] sm:$0xff]  ;;  %v954_v29 = vld [vmem:[%s1896_s1 + $0x238] sm:$0xff] }
  0x7e   :  { %v76_v57 = vmul.f32 %v933_v39, %v63_v16  ;;  %v83_v63 = vmul.f32 %v935_v40, %v63_v16  ;;  %v947_v16 = vld [vmem:[%s1896_s1 + $0x220] sm:$0xff] }
  0x7f   :  { %v72_v7 = vadd.f32 %v70_v42, %v47_v50  ;;  %v79_v8 = vadd.f32 %v77_v43, %v54_v54  ;;  %v86_v11 = vadd.f32 %v84_v51, %v61_v55  ;;  %v71_v17 = vadd.f32 %v69_v56, %v46_v41  ;;  %v951_v35 = vld [vmem:[%s1896_s1 + $0x140] sm:$0xff]  ;;  %v958_v42 = vld [vmem:[%s1896_s1 + $0x158] sm:$0xff]  ;;  %v960_v43 = vld [vmem:[%s1896_s1 + $0x248] sm:$0xff] }
  0x80   :  { %v90_v36 = vpop.permute.xlu1 %89  ;;  %v88_v37 = vpop.permute.xlu0 %87  ;;  %v78_v18 = vadd.f32 %v76_v57, %v53_v48  ;;  %v85_v24 = vadd.f32 %v83_v63, %v60_v49  ;;  %v955_v50 = vld [vmem:[%s1896_s1 + $0x60] sm:$0xff]  ;;  %v957_v51 = vld [vmem:[%s1896_s1 + $0x150] sm:$0xff] }
  0x81   :  { %v95_v2 = vmul.f32 %v938_v44, %v90_v36  ;;  %v102_v3 = vmul.f32 %v940_v45, %v90_v36  ;;  %v109_v4 = vmul.f32 %v942_v46, %v90_v36  ;;  %v94_v9 = vmul.f32 %v937_v52, %v88_v37  ;;  %v953_v36 = vld [vmem:[%s1896_s1 + $0x230] sm:$0xff]  ;;  %v959_v52 = vld [vmem:[%s1896_s1 + $0x240] sm:$0xff] }
  0x82   :  { %v101_v10 = vmul.f32 %v939_v53, %v88_v37  ;;  %v108_v12 = vmul.f32 %v941_v58, %v88_v37  ;;  %v956_v37 = vld [vmem:[%s1896_s1 + $0x68] sm:$0xff] }
  0x83   :  { %v97_v25 = vadd.f32 %v95_v2, %v72_v7  ;;  %v104_v26 = vadd.f32 %v102_v3, %v79_v8  ;;  %v111_v27 = vadd.f32 %v109_v4, %v86_v11  ;;  %v96_v31 = vadd.f32 %v94_v9, %v71_v17  ;;  %v964_v58 = vld [vmem:[%s1896_s1 + $0x168] sm:$0xff]  ;;  %v963_v7 = vld [vmem:[%s1896_s1 + $0x160] sm:$0xff] }
  0x84   :  { %v115_v61 = vpop.permute.xlu1 %114  ;;  %v113_v62 = vpop.permute.xlu0 %112  ;;  %v103_v32 = vadd.f32 %v101_v10, %v78_v18  ;;  %v110_v38 = vadd.f32 %v108_v12, %v85_v24  ;;  %v198_v10 = vmul.f32 %v964_v58, %v1176_v1 }
  0x85   :  { %v120_v13 = vmul.f32 %v944_v59, %v115_v61  ;;  %v127_v14 = vmul.f32 %v946_v60, %v115_v61  ;;  %v134_v19 = vmul.f32 %v948_v5, %v115_v61  ;;  %v119_v20 = vmul.f32 %v943_v6, %v113_v62  ;;  %v966_v59 = vld [vmem:[%s1896_s1 + $0x258] sm:$0xff]  ;;  %v961_v6 = vld [vmem:[%s1896_s1 + $0x70] sm:$0xff] }
  0x86   :  { %v126_v33 = vmul.f32 %v945_v15, %v113_v62  ;;  %v133_v34 = vmul.f32 %v947_v16, %v113_v62  ;;  %v205_v11 = vmul.f32 %v966_v59, %v1176_v1  ;;  %v197_v1 = vmul.f32 %v963_v7, %v1167_v0  ;;  %v983_v7 = vld [vmem:[%s1896_s1 + $0x280] sm:$0xff] }
  0x87   :  { %v122_v39 = vadd.f32 %v120_v13, %v97_v25  ;;  %v129_v40 = vadd.f32 %v127_v14, %v104_v26  ;;  %v136_v44 = vadd.f32 %v134_v19, %v111_v27  ;;  %v121_v45 = vadd.f32 %v119_v20, %v96_v31  ;;  %v965_v13 = vld [vmem:[%s1896_s1 + $0x250] sm:$0xff]  ;;  %v970_v26 = vld [vmem:[%s1896_s1 + $0x178] sm:$0xff]  ;;  %v972_v27 = vld [vmem:[%s1896_s1 + $0x268] sm:$0xff] }
  0x88   :  { %v140_v22 = vpop.permute.xlu1 %139  ;;  %v138_v23 = vpop.permute.xlu0 %137  ;;  %v128_v60 = vadd.f32 %v126_v33, %v103_v32  ;;  %v135_v61 = vadd.f32 %v133_v34, %v110_v38  ;;  %v969_v34 = vld [vmem:[%s1896_s1 + $0x170] sm:$0xff] }
  0x89   :  { %v145_v41 = vmul.f32 %v950_v21, %v140_v22  ;;  %v152_v46 = vmul.f32 %v952_v28, %v140_v22  ;;  %v159_v48 = vmul.f32 %v954_v29, %v140_v22  ;;  %v144_v54 = vmul.f32 %v949_v30, %v138_v23  ;;  %v968_v21 = vld [vmem:[%s1896_s1 + $0x88] sm:$0xff]  ;;  %v967_v29 = vld [vmem:[%s1896_s1 + $0x80] sm:$0xff] }
  0x8a   :  { %v151_v55 = vmul.f32 %v951_v35, %v138_v23  ;;  %v158_v56 = vmul.f32 %v953_v36, %v138_v23  ;;  %v190_v22 = vmul.f32 %v961_v6, %v1167_v0  ;;  %v204_v28 = vmul.f32 %v965_v13, %v1167_v0  ;;  %v971_v35 = vld [vmem:[%s1896_s1 + $0x260] sm:$0xff]  ;;  %v974_v0 = vld [vmem:[%s1896_s1 + $0x98] sm:$0xff]  ;;  %v988_v13 = vld [vmem:[%s1896_s1 + $0x1a8] sm:$0xff] }
  0x8b   :  { %v147_v2 = vadd.f32 %v145_v41, %v122_v39  ;;  %v154_v8 = vadd.f32 %v152_v46, %v129_v40  ;;  %v161_v9 = vadd.f32 %v159_v48, %v136_v44  ;;  %v146_v15 = vadd.f32 %v144_v54, %v121_v45  ;;  %v973_v44 = vld [vmem:[%s1896_s1 + $0x90] sm:$0xff]  ;;  %v975_v45 = vld [vmem:[%s1896_s1 + $0x180] sm:$0xff] }
  0x8c   :  { %v165_v49 = vpop.permute.xlu1 %164  ;;  %v163_v53 = vpop.permute.xlu0 %162  ;;  %v153_v16 = vadd.f32 %v151_v55, %v128_v60  ;;  %v160_v17 = vadd.f32 %v158_v56, %v135_v61 }
  0x8d   :  { %v170_v57 = vmul.f32 %v956_v37, %v165_v49  ;;  %v177_v62 = vmul.f32 %v958_v42, %v165_v49  ;;  %v184_v63 = vmul.f32 %v960_v43, %v165_v49  ;;  %v169_v3 = vmul.f32 %v955_v50, %v163_v53  ;;  %v978_v43 = vld [vmem:[%s1896_s1 + $0x278] sm:$0xff] }
  0x8e   :  { %v176_v4 = vmul.f32 %v957_v51, %v163_v53  ;;  %v183_v5 = vmul.f32 %v959_v52, %v163_v53  ;;  %v977_v51 = vld [vmem:[%s1896_s1 + $0x270] sm:$0xff]  ;;  %v980_v52 = vld [vmem:[%s1896_s1 + $0xa8] sm:$0xff]  ;;  %v982_v53 = vld [vmem:[%s1896_s1 + $0x198] sm:$0xff] }
  0x8f   :  { %v172_v18 = vadd.f32 %v170_v57, %v147_v2  ;;  %v179_v19 = vadd.f32 %v177_v62, %v154_v8  ;;  %v186_v20 = vadd.f32 %v184_v63, %v161_v9  ;;  %v171_v23 = vadd.f32 %v169_v3, %v146_v15  ;;  %v984_v62 = vld [vmem:[%s1896_s1 + $0x288] sm:$0xff]  ;;  %v979_v63 = vld [vmem:[%s1896_s1 + $0xa0] sm:$0xff]  ;;  %v981_v2 = vld [vmem:[%s1896_s1 + $0x190] sm:$0xff] }
  0x90   :  { %v211_v12 = vpop.permute.xlu1 %210  ;;  %v209_v14 = vpop.permute.xlu0 %208  ;;  %v178_v24 = vadd.f32 %v176_v4, %v153_v16  ;;  %v185_v25 = vadd.f32 %v183_v5, %v160_v17  ;;  %v986_v8 = vld [vmem:[%s1896_s1 + $0xb8] sm:$0xff] }
  0x91   :  { %v193_v32 = vadd.f32 %v1297_v47, %v172_v18  ;;  %v216_v33 = vmul.f32 %v968_v21, %v211_v12  ;;  %v200_v36 = vadd.f32 %v198_v10, %v179_v19  ;;  %v207_v37 = vadd.f32 %v205_v11, %v186_v20  ;;  %v976_v47 = vld [vmem:[%s1896_s1 + $0x188] sm:$0xff]  ;;  %v990_v20 = vld [vmem:[%s1896_s1 + $0x298] sm:$0xff]  ;;  %v985_v21 = vld [vmem:[%s1896_s1 + $0xb0] sm:$0xff] }
  0x92   :  { %v223_v38 = vmul.f32 %v970_v26, %v211_v12  ;;  %v230_v39 = vmul.f32 %v972_v27, %v211_v12  ;;  %v192_v40 = vadd.f32 %v190_v22, %v171_v23  ;;  %v199_v41 = vadd.f32 %v197_v1, %v178_v24  ;;  %v987_v22 = vld [vmem:[%s1896_s1 + $0x1a0] sm:$0xff]  ;;  %v989_v26 = vld [vmem:[%s1896_s1 + $0x290] sm:$0xff] }
  0x93   :  { %v206_v42 = vadd.f32 %v204_v28, %v185_v25  ;;  %v215_v46 = vmul.f32 %v967_v29, %v209_v14  ;;  %v222_v48 = vmul.f32 %v969_v34, %v209_v14  ;;  %v229_v49 = vmul.f32 %v971_v35, %v209_v14 }
  0x94   :  { %v236_v30 = vpop.permute.xlu1 %235  ;;  %v234_v31 = vpop.permute.xlu0 %233  ;;  %v218_v56 = vadd.f32 %v216_v33, %v193_v32  ;;  %v225_v58 = vadd.f32 %v223_v38, %v200_v36  ;;  %v232_v59 = vadd.f32 %v230_v39, %v207_v37  ;;  %v994_v32 = vld [vmem:[%s1896_s1 + $0x1b8] sm:$0xff]  ;;  %v996_v33 = vld [vmem:[%s1896_s1 + $0x2a8] sm:$0xff]  ;;  %v991_v38 = vld [vmem:[%s1896_s1 + $0xc0] sm:$0xff] }
  0x95   :  { %v241_v50 = vmul.f32 %v974_v0, %v236_v30  ;;  %v248_v57 = vmul.f32 %v976_v47, %v236_v30  ;;  %v255_v60 = vmul.f32 %v978_v43, %v236_v30  ;;  %v240_v61 = vmul.f32 %v973_v44, %v234_v31  ;;  %v993_v39 = vld [vmem:[%s1896_s1 + $0x1b0] sm:$0xff]  ;;  %v995_v47 = vld [vmem:[%s1896_s1 + $0x2a0] sm:$0xff] }
  0x96   :  { %v247_v3 = vmul.f32 %v975_v45, %v234_v31  ;;  %v254_v4 = vmul.f32 %v977_v51, %v234_v31  ;;  %v217_v9 = vadd.f32 %v215_v46, %v192_v40  ;;  %v224_v10 = vadd.f32 %v222_v48, %v199_v41  ;;  %v992_v31 = vld [vmem:[%s1896_s1 + $0xc8] sm:$0xff]  ;;  %v1002_v51 = vld [vmem:[%s1896_s1 + $0x2b8] sm:$0xff] }
  0x97   :  { %v231_v11 = vadd.f32 %v229_v49, %v206_v42  ;;  %v243_v12 = vadd.f32 %v241_v50, %v218_v56  ;;  %v250_v16 = vadd.f32 %v248_v57, %v225_v58  ;;  %v257_v1 = vadd.f32 %v255_v60, %v232_v59  ;;  %v998_v50 = vld [vmem:[%s1896_s1 + $0xd8] sm:$0xff]  ;;  %v1001_v57 = vld [vmem:[%s1896_s1 + $0x2b0] sm:$0xff] }
  0x98   :  { %v261_v54 = vpop.permute.xlu1 %260  ;;  %v259_v55 = vpop.permute.xlu0 %258  ;;  %v242_v23 = vadd.f32 %v240_v61, %v217_v9  ;;  %v249_v27 = vadd.f32 %v247_v3, %v224_v10  ;;  %v1000_v3 = vld [vmem:[%s1896_s1 + $0x1c8] sm:$0xff] }
  0x99   :  { %v266_v5 = vmul.f32 %v980_v52, %v261_v54  ;;  %v273_v6 = vmul.f32 %v982_v53, %v261_v54  ;;  %v280_v17 = vmul.f32 %v984_v62, %v261_v54  ;;  %v265_v18 = vmul.f32 %v979_v63, %v259_v55  ;;  %v997_v52 = vld [vmem:[%s1896_s1 + $0xd0] sm:$0xff] }
  0x9a   :  { %v272_v19 = vmul.f32 %v981_v2, %v259_v55  ;;  %v279_v24 = vmul.f32 %v983_v7, %v259_v55  ;;  %v256_v28 = vadd.f32 %v254_v4, %v231_v11  ;;  %v1004_v11 = vld [vmem:[%s1896_s1 + $0xe8] sm:$0xff] }
  0x9b   :  { %v268_v29 = vadd.f32 %v266_v5, %v243_v12  ;;  %v275_v30 = vadd.f32 %v273_v6, %v250_v16  ;;  %v282_v41 = vadd.f32 %v280_v17, %v257_v1  ;;  %v267_v42 = vadd.f32 %v265_v18, %v242_v23  ;;  %v999_v6 = vld [vmem:[%s1896_s1 + $0x1c0] sm:$0xff]  ;;  %v1008_v12 = vld [vmem:[%s1896_s1 + $0x2c8] sm:$0xff]  ;;  %v1006_v18 = vld [vmem:[%s1896_s1 + $0x1d8] sm:$0xff] }
  0x9c   :  { %v286_v14 = vpop.permute.xlu1 %285  ;;  %v284_v15 = vpop.permute.xlu0 %283  ;;  %v274_v43 = vadd.f32 %v272_v19, %v249_v27  ;;  %v281_v45 = vadd.f32 %v279_v24, %v256_v28  ;;  %v1005_v19 = vld [vmem:[%s1896_s1 + $0x1d0] sm:$0xff] }
  0x9d   :  { %v291_v25 = vmul.f32 %v986_v8, %v286_v14  ;;  %v298_v34 = vmul.f32 %v988_v13, %v286_v14  ;;  %v305_v35 = vmul.f32 %v990_v20, %v286_v14  ;;  %v290_v0 = vmul.f32 %v985_v21, %v284_v15  ;;  %v1003_v13 = vld [vmem:[%s1896_s1 + $0xe0] sm:$0xff] }
  0x9e   :  { %v297_v36 = vmul.f32 %v987_v22, %v284_v15  ;;  %v304_v44 = vmul.f32 %v989_v26, %v284_v15  ;;  %v1007_v20 = vld [vmem:[%s1896_s1 + $0x2c0] sm:$0xff]  ;;  %s1135_s1 = smov 8  }
  0x9f   :  { %v293_v46 = vadd.f32 %v291_v25, %v268_v29  ;;  %v300_v58 = vadd.f32 %v298_v34, %v275_v30  ;;  %v307_v59 = vadd.f32 %v305_v35, %v282_v41  ;;  %v292_v60 = vadd.f32 %v290_v0, %v267_v42 }
  0xa0   :  { %v311_v37 = vpop.permute.xlu1 %310  ;;  %v309_v40 = vpop.permute.xlu0 %308  ;;  %v299_v61 = vadd.f32 %v297_v36, %v274_v43  ;;  %v306_v2 = vadd.f32 %v304_v44, %v281_v45 }
  0xa1   :  { %v316_v48 = vmul.f32 %v992_v31, %v311_v37  ;;  %v330_v49 = vmul.f32 %v996_v33, %v311_v37  ;;  %v323_v53 = vmul.f32 %v994_v32, %v311_v37  ;;  %v315_v54 = vmul.f32 %v991_v38, %v309_v40 }
  0xa2   :  { %v322_v55 = vmul.f32 %v993_v39, %v309_v40  ;;  %v329_v56 = vmul.f32 %v995_v47, %v309_v40 }
  0xa3   :  { %v318_v8 = vadd.f32 %v316_v48, %v293_v46  ;;  %v332_v9 = vadd.f32 %v330_v49, %v307_v59  ;;  %v325_v14 = vadd.f32 %v323_v53, %v300_v58  ;;  %v317_v15 = vadd.f32 %v315_v54, %v292_v60 }
  0xa4   :  { %v336_v62 = vpop.permute.xlu1 %335  ;;  %v334_v63 = vpop.permute.xlu0 %333  ;;  %v324_v16 = vadd.f32 %v322_v55, %v299_v61  ;;  %v331_v17 = vadd.f32 %v329_v56, %v306_v2 }
  0xa5   :  { %v341_v4 = vmul.f32 %v998_v50, %v336_v62  ;;  %v355_v5 = vmul.f32 %v1002_v51, %v336_v62  ;;  %v340_v7 = vmul.f32 %v997_v52, %v334_v63  ;;  %v354_v10 = vmul.f32 %v1001_v57, %v334_v63 }
  0xa6   :  { %v348_v22 = vmul.f32 %v1000_v3, %v336_v62  ;;  %v347_v23 = vmul.f32 %v999_v6, %v334_v63 }
  0xa7   :  { %v343_v21 = vadd.f32 %v341_v4, %v318_v8  ;;  %v357_v1 = vadd.f32 %v355_v5, %v332_v9  ;;  %v342_v26 = vadd.f32 %v340_v7, %v317_v15  ;;  %v356_v30 = vadd.f32 %v354_v10, %v331_v17 }
  0xa8   :  { %v361_v24 = vpop.permute.xlu1 %360  ;;  %v359_v25 = vpop.permute.xlu0 %358  ;;  %v350_v36 = vadd.f32 %v348_v22, %v325_v14  ;;  %v349_v37 = vadd.f32 %v347_v23, %v324_v16 }
  0xa9   :  { %v366_v27 = vmul.f32 %v1004_v11, %v361_v24  ;;  %v380_v28 = vmul.f32 %v1008_v12, %v361_v24  ;;  %v365_v29 = vmul.f32 %v1003_v13, %v359_v25  ;;  %v373_v31 = vmul.f32 %v1006_v18, %v361_v24 }
  0xaa   :  { %v372_v32 = vmul.f32 %v1005_v19, %v359_v25  ;;  %v379_v33 = vmul.f32 %v1007_v20, %v359_v25  ;;  %v405_v25 = vld [vmem:[%s1897_s3] sm:$0x1] }
  0xab   :  { %v368_v34 = vadd.f32 %v366_v27, %v343_v21  ;;  %v382_v35 = vadd.f32 %v380_v28, %v357_v1  ;;  %v367_v0 = vadd.f32 %v365_v29, %v342_v26  ;;  %v375_v41 = vadd.f32 %v373_v31, %v350_v36  ;;  %v406_v29 = vld [vmem:[%s1897_s3 + $0x1] sm:$0x1] }
  0xac   :  { %v381_v38 = vadd.f32 %v379_v33, %v356_v30  ;;  %v374_v42 = vadd.f32 %v372_v32, %v349_v37  ;;  %v453_v1 = vlaneseq }
  0xad   :  { %v387_v39 = vrot.slane %v368_v34, 7  ;;  %v396_v47 = vrot.slane %v382_v35, 1  ;;  %v386_v40 = vrot.slane %v367_v0, 7 }
  0xae   :  { %v395_v43 = vrot.slane %v381_v38, 1  ;;  %v454_v23 = vshrl.u32 %v453_v1, 7 }
  0xaf   :  { %v388_v44 = vsel %vm385_vm0, %v386_v40, %v387_v39  ;;  %v391_v45 = vsel %vm385_vm0, 0.0, %v386_v40  ;;  %v400_v49 = vsel %vm394_vm1, %v396_v47, 0.0 }
  0xb0   :  { %v401_v46 = vadd.f32 %v391_v45, %v374_v42  ;;  %v402_v48 = vadd.f32 %v388_v44, %v375_v41  ;;  %v397_v50 = vsel %vm394_vm1, %v395_v43, %v396_v47  ;;  %v1522_v26 = vsub.s32 0, %v454_v23  ;;  %v472_v42 = vld [vmem:[%s1898_s2 + $0x8] sm:$0xff]  ;;  %v1014_v43 = vld [vmem:[%s1898_s2 + $0x18] sm:$0xff] }
  0xb1   :  { %v1016_v44 = vld [vmem:[%s1898_s2 + $0x108] sm:$0xff]  ;;  %v1018_v45 = vld [vmem:[%s1898_s2 + $0x1f8] sm:$0xff] }
  0xb2   :  { %v403_v51 = vadd.f32 %v401_v46, %v397_v50  ;;  %v404_v52 = vadd.f32 %v402_v48, %v400_v49  ;;  %v1013_v46 = vld [vmem:[%s1898_s2 + $0x10] sm:$0xff]  ;;  %v1010_v50 = vld [vmem:[%s1898_s2 + $0xf8] sm:$0xff] }
  0xb4   :  { %v414_v53 = vmul.f32 %v403_v51, %v403_v51  ;;  %v407_v54 = vadd.f32 %v404_v52, %v403_v51  ;;  %v415_v55 = vmul.f32 %v404_v52, %v404_v52 }
  0xb6   :  { %v408_v56 = vrot.slane %v407_v54, 4  ;;  %v416_v57 = vadd.f32 %v415_v55, %v414_v53  ;;  %v1012_v53 = vld [vmem:[%s1898_s2 + $0x1e8] sm:$0xff]  ;;  %v1009_v55 = vld [vmem:[%s1898_s2 + $0xf0] sm:$0xff] }
  0xb8   :  { %v409_v58 = vadd.f32 %v408_v56, %v407_v54  ;;  %v417_v59 = vrot.slane %v416_v57, 4  ;;  %v471_v54 = vld [vmem:[%s1898_s2] sm:$0xff] }
  0xba   :  { %v410_v60 = vrot.slane %v409_v58, 2  ;;  %v418_v61 = vadd.f32 %v417_v59, %v416_v57  ;;  %v1011_v57 = vld [vmem:[%s1898_s2 + $0x1e0] sm:$0xff] }
  0xbc   :  { %v411_v62 = vadd.f32 %v410_v60, %v409_v58  ;;  %v419_v63 = vrot.slane %v418_v61, 2 }
  0xbe   :  { %v412_v2 = vrot.slane %v411_v62, 1  ;;  %v420_v3 = vadd.f32 %v419_v63, %v418_v61  ;;  %v1020_v61 = vld [vmem:[%s1898_s2 + $0x28] sm:$0xff] }
  0xc0   :  { %v421_v4 = vrot.slane %v420_v3, 1  ;;  %v413_v5 = vadd.f32 %v412_v2, %v411_v62  ;;  %v1022_v62 = vld [vmem:[%s1898_s2 + $0x118] sm:$0xff] }
  0xc2   :  { %v422_v6 = vadd.f32 %v421_v4, %v420_v3  ;;  %v1024_v4 = vld [vmem:[%s1898_s2 + $0x208] sm:$0xff] }
  0xc4   :  { %v423_v7 = vsel %vm385_vm0, %v413_v5, %v422_v6 }
  0xc5   :  { %424 = vrot.lane.b32.xlu0 %v423_v7, %s1124_s22 }
 0x137   :  { %v425_v8 = vpop.permute.xlu0 %424 }
 0x138   :  { %v426_v9 = vadd.f32 %v425_v8, %v423_v7 }
 0x13a   :  { %427 = vrot.lane.b32.xlu1 %v426_v9, %s1135_s1 }
 0x1ac   :  { %v428_v10 = vpop.permute.xlu1 %427 }
 0x1ad   :  { %v429_v11 = vadd.f32 %v428_v10, %v426_v9 }
 0x1af   :  { %430 = vrot.lane.b32.xlu0 %v429_v11, %s1136_s7 }
 0x221   :  { %v431_v12 = vpop.permute.xlu0 %430 }
 0x222   :  { %v432_v13 = vadd.f32 %v431_v12, %v429_v11  ;;  %v1019_v11 = vld [vmem:[%s1898_s2 + $0x20] sm:$0xff]  ;;  %v1021_v12 = vld [vmem:[%s1898_s2 + $0x110] sm:$0xff] }
 0x224   :  { %433 = vrot.lane.b32.xlu1 %v432_v13, %s1137_s8 }
 0x296   :  { %v434_v14 = vpop.permute.xlu1 %433 }
 0x297   :  { %v435_v15 = vadd.f32 %v434_v14, %v432_v13  ;;  %v1023_v13 = vld [vmem:[%s1898_s2 + $0x200] sm:$0xff] }
 0x299   :  { %436 = vrot.lane.b32.xlu0 %v435_v15, %s1138_s9 }
 0x30b   :  { %v437_v16 = vpop.permute.xlu0 %436 }
 0x30c   :  { %v438_v17 = vadd.f32 %v437_v16, %v435_v15 }
 0x30e   :  { %v439_v18 = vmul.f32 0.001953125, %v438_v17 }
 0x310   :  { %v440_v19 = vmul.f32 %v439_v18, %v439_v18 }
 0x312   :  { %v442_v20 = vrot.slane %v440_v19, 7  ;;  %v1028_v19 = vld [vmem:[%s1898_s2 + $0x128] sm:$0xff] }
 0x314   :  { %v444_v21 = vsub.f32 %v439_v18, %v442_v20  ;;  %v1030_v20 = vld [vmem:[%s1898_s2 + $0x218] sm:$0xff] }
 0x316   :  { %v445_v22 = vadd.f32 1e-05, %v444_v21 }
 0x318   :  { %1115 = vrsqrt.f32 %v445_v22 }
 0x325   :  { %v1116_v24 = vpop.eup %1115 }
 0x326   :  { %v448_v27 = vrot.slane %v1116_v24, 1  ;;  %v1025_v24 = vld [vmem:[%s1898_s2 + $0x30] sm:$0xff] }
 0x328   :  { %v450_v28 = vmul.f32 %v448_v27, %v405_v25  ;;  %v1027_v25 = vld [vmem:[%s1898_s2 + $0x120] sm:$0xff] }
 0x32a   :  { %v451_v30 = vmul.f32 %v450_v28, %v439_v18  ;;  %v456_v31 = vrot.slane %v450_v28, %v1522_v26  ;;  %v1026_v18 = vld [vmem:[%s1898_s2 + $0x38] sm:$0xff] }
 0x32c   :  { %v452_v32 = vsub.f32 %v406_v29, %v451_v30  ;;  %v457_v33 = vmul.f32 %v456_v31, %v403_v51  ;;  %v458_v34 = vmul.f32 %v456_v31, %v404_v52  ;;  %v1015_v51 = vld [vmem:[%s1898_s2 + $0x100] sm:$0xff]  ;;  %v1017_v52 = vld [vmem:[%s1898_s2 + $0x1f0] sm:$0xff] }
 0x32d   :  { %v1029_v31 = vld [vmem:[%s1898_s2 + $0x210] sm:$0xff] }
 0x32e   :  { %v462_v35 = vrot.slane %v452_v32, %v1522_v26  ;;  %v1032_v32 = vld [vmem:[%s1898_s2 + $0x48] sm:$0xff] }
 0x330   :  { %v463_v0 = vadd.f32 %v462_v35, %v457_v33  ;;  %v464_v36 = vadd.f32 %v462_v35, %v458_v34  ;;  %v1034_v33 = vld [vmem:[%s1898_s2 + $0x138] sm:$0xff] }
 0x332   :  { %v1529_v37 = vmax.f32 %v463_v0, 0.0  ;;  %v1531_v38 = vmax.f32 %v464_v36, 0.0 }
 0x334   :  { %469 = vrot.lane.b32.xlu0 %v1531_v38, %s1122_s18  ;;  %467 = vrot.lane.b32.xlu1 %v1529_v37, %s1122_s18 }
 0x338   :  { %487 = vrot.lane.b32.xlu0 %v1531_v38, %s1121_s17  ;;  %485 = vrot.lane.b32.xlu1 %v1529_v37, %s1121_s17 }
 0x33c   :  { %512 = vrot.lane.b32.xlu0 %v1531_v38, %s1123_s21  ;;  %510 = vrot.lane.b32.xlu1 %v1529_v37, %s1123_s21 }
 0x340   :  { %537 = vrot.lane.b32.xlu0 %v1531_v38, %s1124_s22  ;;  %535 = vrot.lane.b32.xlu1 %v1529_v37, %s1124_s22 }
 0x344   :  { %562 = vrot.lane.b32.xlu0 %v1531_v38, %s1125_s23  ;;  %560 = vrot.lane.b32.xlu1 %v1529_v37, %s1125_s23 }
 0x348   :  { %587 = vrot.lane.b32.xlu0 %v1531_v38, %s1126_s24  ;;  %585 = vrot.lane.b32.xlu1 %v1529_v37, %s1126_s24 }
 0x34c   :  { %612 = vrot.lane.b32.xlu0 %v1531_v38, %s1127_s25  ;;  %610 = vrot.lane.b32.xlu1 %v1529_v37, %s1127_s25 }
 0x350   :  { %658 = vrot.lane.b32.xlu0 %v1531_v38, %s1128_s26  ;;  %656 = vrot.lane.b32.xlu1 %v1529_v37, %s1128_s26 }
 0x354   :  { %683 = vrot.lane.b32.xlu0 %v1531_v38, %s1129_s27  ;;  %681 = vrot.lane.b32.xlu1 %v1529_v37, %s1129_s27 }
 0x358   :  { %708 = vrot.lane.b32.xlu0 %v1531_v38, %s1130_s28  ;;  %706 = vrot.lane.b32.xlu1 %v1529_v37, %s1130_s28 }
 0x35c   :  { %733 = vrot.lane.b32.xlu0 %v1531_v38, %s1131_s29  ;;  %731 = vrot.lane.b32.xlu1 %v1529_v37, %s1131_s29 }
 0x360   :  { %758 = vrot.lane.b32.xlu0 %v1531_v38, %s1132_s30  ;;  %756 = vrot.lane.b32.xlu1 %v1529_v37, %s1132_s30 }
 0x364   :  { %783 = vrot.lane.b32.xlu0 %v1531_v38, %s1133_s5  ;;  %781 = vrot.lane.b32.xlu1 %v1529_v37, %s1133_s5 }
 0x368   :  { %808 = vrot.lane.b32.xlu0 %v1531_v38, %s1134_s6  ;;  %806 = vrot.lane.b32.xlu1 %v1529_v37, %s1134_s6 }
 0x3a6   :  { %v470_v39 = vpop.permute.xlu0 %469  ;;  %v468_v47 = vpop.permute.xlu1 %467 }
 0x3a7   :  { %v474_v63 = vmul.f32 %v472_v42, %v470_v39  ;;  %v479_v7 = vmul.f32 %v1010_v50, %v470_v39  ;;  %v484_v8 = vmul.f32 %v1012_v53, %v470_v39  ;;  %v473_v9 = vmul.f32 %v471_v54, %v468_v47 }
 0x3a8   :  { %v478_v10 = vmul.f32 %v1009_v55, %v468_v47  ;;  %v483_v14 = vmul.f32 %v1011_v57, %v468_v47  ;;  %v1038_v57 = vld [vmem:[%s1898_s2 + $0x58] sm:$0xff] }
 0x3aa   :  { %v488_v40 = vpop.permute.xlu0 %487  ;;  %v486_v41 = vpop.permute.xlu1 %485 }
 0x3ab   :  { %v493_v56 = vmul.f32 %v1014_v43, %v488_v40  ;;  %v500_v58 = vmul.f32 %v1016_v44, %v488_v40  ;;  %v507_v59 = vmul.f32 %v1018_v45, %v488_v40  ;;  %v492_v60 = vmul.f32 %v1013_v46, %v486_v41  ;;  %v1036_v40 = vld [vmem:[%s1898_s2 + $0x228] sm:$0xff] }
 0x3ac   :  { %v499_v2 = vmul.f32 %v1015_v51, %v486_v41  ;;  %v506_v3 = vmul.f32 %v1017_v52, %v486_v41  ;;  %v1031_v41 = vld [vmem:[%s1898_s2 + $0x40] sm:$0xff] }
 0x3ad   :  { %v495_v15 = vadd.f32 %v493_v56, %v474_v63  ;;  %v502_v21 = vadd.f32 %v500_v58, %v479_v7  ;;  %v509_v22 = vadd.f32 %v507_v59, %v484_v8  ;;  %v494_v1 = vadd.f32 %v492_v60, %v473_v9  ;;  %v1035_v52 = vld [vmem:[%s1898_s2 + $0x220] sm:$0xff] }
 0x3ae   :  { %v513_v48 = vpop.permute.xlu0 %512  ;;  %v511_v49 = vpop.permute.xlu1 %510  ;;  %v501_v27 = vadd.f32 %v499_v2, %v478_v10  ;;  %v508_v28 = vadd.f32 %v506_v3, %v483_v14  ;;  %v1040_v2 = vld [vmem:[%s1898_s2 + $0x148] sm:$0xff]  ;;  %v1042_v3 = vld [vmem:[%s1898_s2 + $0x238] sm:$0xff]  ;;  %v1039_v9 = vld [vmem:[%s1898_s2 + $0x140] sm:$0xff] }
 0x3af   :  { %v518_v16 = vmul.f32 %v1020_v61, %v513_v48  ;;  %v525_v17 = vmul.f32 %v1022_v62, %v513_v48  ;;  %v532_v23 = vmul.f32 %v1024_v4, %v513_v48  ;;  %v517_v29 = vmul.f32 %v1019_v11, %v511_v49  ;;  %v1037_v4 = vld [vmem:[%s1898_s2 + $0x50] sm:$0xff]  ;;  %v1044_v11 = vld [vmem:[%s1898_s2 + $0x68] sm:$0xff] }
 0x3b0   :  { %v524_v30 = vmul.f32 %v1021_v12, %v511_v49  ;;  %v531_v0 = vmul.f32 %v1023_v13, %v511_v49  ;;  %v1033_v49 = vld [vmem:[%s1898_s2 + $0x130] sm:$0xff] }
 0x3b1   :  { %v520_v42 = vadd.f32 %v518_v16, %v495_v15  ;;  %v527_v43 = vadd.f32 %v525_v17, %v502_v21  ;;  %v534_v46 = vadd.f32 %v532_v23, %v509_v22  ;;  %v519_v53 = vadd.f32 %v517_v29, %v494_v1  ;;  %v1041_v10 = vld [vmem:[%s1898_s2 + $0x230] sm:$0xff]  ;;  %v1046_v16 = vld [vmem:[%s1898_s2 + $0x158] sm:$0xff]  ;;  %v1048_v17 = vld [vmem:[%s1898_s2 + $0x248] sm:$0xff] }
 0x3b2   :  { %v538_v5 = vpop.permute.xlu0 %537  ;;  %v536_v6 = vpop.permute.xlu1 %535  ;;  %v526_v54 = vadd.f32 %v524_v30, %v501_v27  ;;  %v533_v60 = vadd.f32 %v531_v0, %v508_v28  ;;  %v1043_v1 = vld [vmem:[%s1898_s2 + $0x60] sm:$0xff]  ;;  %v1045_v23 = vld [vmem:[%s1898_s2 + $0x150] sm:$0xff] }
 0x3b3   :  { %v543_v36 = vmul.f32 %v1026_v18, %v538_v5  ;;  %v550_v39 = vmul.f32 %v1028_v19, %v538_v5  ;;  %v557_v47 = vmul.f32 %v1030_v20, %v538_v5  ;;  %v542_v44 = vmul.f32 %v1025_v24, %v536_v6  ;;  %v1047_v24 = vld [vmem:[%s1898_s2 + $0x240] sm:$0xff] }
 0x3b4   :  { %v549_v45 = vmul.f32 %v1027_v25, %v536_v6  ;;  %v556_v48 = vmul.f32 %v1029_v31, %v536_v6 }
 0x3b5   :  { %v545_v61 = vadd.f32 %v543_v36, %v520_v42  ;;  %v552_v62 = vadd.f32 %v550_v39, %v527_v43  ;;  %v559_v63 = vadd.f32 %v557_v47, %v534_v46  ;;  %v544_v5 = vadd.f32 %v542_v44, %v519_v53 }
 0x3b6   :  { %v563_v34 = vpop.permute.xlu0 %562  ;;  %v561_v35 = vpop.permute.xlu1 %560  ;;  %v551_v6 = vadd.f32 %v549_v45, %v526_v54  ;;  %v558_v12 = vadd.f32 %v556_v48, %v533_v60  ;;  %v1056_v54 = vld [vmem:[%s1898_s2 + $0x88] sm:$0xff]  ;;  %v1058_v60 = vld [vmem:[%s1898_s2 + $0x178] sm:$0xff] }
 0x3b7   :  { %v568_v50 = vmul.f32 %v1032_v32, %v563_v34  ;;  %v575_v51 = vmul.f32 %v1034_v33, %v563_v34  ;;  %v582_v55 = vmul.f32 %v1036_v40, %v563_v34  ;;  %v567_v56 = vmul.f32 %v1031_v41, %v561_v35  ;;  %v1050_v41 = vld [vmem:[%s1898_s2 + $0x78] sm:$0xff] }
 0x3b8   :  { %v574_v7 = vmul.f32 %v1033_v49, %v561_v35  ;;  %v581_v8 = vmul.f32 %v1035_v52, %v561_v35  ;;  %v1049_v49 = vld [vmem:[%s1898_s2 + $0x70] sm:$0xff] }
 0x3b9   :  { %v570_v13 = vadd.f32 %v568_v50, %v545_v61  ;;  %v577_v14 = vadd.f32 %v575_v51, %v552_v62  ;;  %v584_v18 = vadd.f32 %v582_v55, %v559_v63  ;;  %v569_v19 = vadd.f32 %v567_v56, %v544_v5  ;;  %v1052_v50 = vld [vmem:[%s1898_s2 + $0x168] sm:$0xff]  ;;  %v1054_v51 = vld [vmem:[%s1898_s2 + $0x258] sm:$0xff]  ;;  %v1051_v55 = vld [vmem:[%s1898_s2 + $0x160] sm:$0xff] }
 0x3ba   :  { %v588_v58 = vpop.permute.xlu0 %587  ;;  %v586_v59 = vpop.permute.xlu1 %585  ;;  %v576_v31 = vadd.f32 %v574_v7, %v551_v6  ;;  %v583_v32 = vadd.f32 %v581_v8, %v558_v12  ;;  %v1053_v56 = vld [vmem:[%s1898_s2 + $0x250] sm:$0xff]  ;;  %v1060_v61 = vld [vmem:[%s1898_s2 + $0x268] sm:$0xff]  ;;  %v639_v62 = vmul.f32 %v1050_v41, %v1531_v38  ;;  %v646_v63 = vmul.f32 %v1052_v50, %v1531_v38  ;;  %v1062_v12 = vld [vmem:[%s1898_s2 + $0x98] sm:$0xff] }
 0x3bb   :  { %v593_v15 = vmul.f32 %v1038_v57, %v588_v58  ;;  %v600_v20 = vmul.f32 %v1040_v2, %v588_v58  ;;  %v607_v21 = vmul.f32 %v1042_v3, %v588_v58  ;;  %v592_v27 = vmul.f32 %v1037_v4, %v586_v59  ;;  %v1055_v3 = vld [vmem:[%s1898_s2 + $0x80] sm:$0xff] }
 0x3bc   :  { %v599_v28 = vmul.f32 %v1039_v9, %v586_v59  ;;  %v606_v29 = vmul.f32 %v1041_v10, %v586_v59  ;;  %v653_v2 = vmul.f32 %v1054_v51, %v1531_v38  ;;  %v638_v4 = vmul.f32 %v1049_v49, %v1529_v37  ;;  %v1057_v9 = vld [vmem:[%s1898_s2 + $0x170] sm:$0xff]  ;;  %v1059_v10 = vld [vmem:[%s1898_s2 + $0x260] sm:$0xff] }
 0x3bd   :  { %v595_v35 = vadd.f32 %v593_v15, %v570_v13  ;;  %v602_v47 = vadd.f32 %v600_v20, %v577_v14  ;;  %v609_v40 = vadd.f32 %v607_v21, %v584_v18  ;;  %v594_v44 = vadd.f32 %v592_v27, %v569_v19  ;;  %v1066_v21 = vld [vmem:[%s1898_s2 + $0x278] sm:$0xff]  ;;  %v1065_v27 = vld [vmem:[%s1898_s2 + $0x270] sm:$0xff] }
 0x3be   :  { %v613_v22 = vpop.permute.xlu0 %612  ;;  %v611_v25 = vpop.permute.xlu1 %610  ;;  %v601_v45 = vadd.f32 %v599_v28, %v576_v31  ;;  %v608_v46 = vadd.f32 %v606_v29, %v583_v32  ;;  %v645_v38 = vmul.f32 %v1051_v55, %v1529_v37  ;;  %v1068_v28 = vld [vmem:[%s1898_s2 + $0xa8] sm:$0xff]  ;;  %v1070_v29 = vld [vmem:[%s1898_s2 + $0x198] sm:$0xff] }
 0x3bf   :  { %v618_v30 = vmul.f32 %v1044_v11, %v613_v22  ;;  %v625_v33 = vmul.f32 %v1046_v16, %v613_v22  ;;  %v632_v34 = vmul.f32 %v1048_v17, %v613_v22  ;;  %v617_v0 = vmul.f32 %v1043_v1, %v611_v25  ;;  %v1064_v17 = vld [vmem:[%s1898_s2 + $0x188] sm:$0xff]  ;;  %v1063_v22 = vld [vmem:[%s1898_s2 + $0x180] sm:$0xff] }
 0x3c0   :  { %v624_v36 = vmul.f32 %v1045_v23, %v611_v25  ;;  %v631_v39 = vmul.f32 %v1047_v24, %v611_v25  ;;  %v652_v11 = vmul.f32 %v1053_v56, %v1529_v37  ;;  %v1061_v37 = vld [vmem:[%s1898_s2 + $0x90] sm:$0xff] }
 0x3c1   :  { %v620_v48 = vadd.f32 %v618_v30, %v595_v35  ;;  %v627_v52 = vadd.f32 %v625_v33, %v602_v47  ;;  %v634_v53 = vadd.f32 %v632_v34, %v609_v40  ;;  %v619_v57 = vadd.f32 %v617_v0, %v594_v44  ;;  %v1067_v47 = vld [vmem:[%s1898_s2 + $0xa0] sm:$0xff]  ;;  %v1069_v40 = vld [vmem:[%s1898_s2 + $0x190] sm:$0xff] }
 0x3c2   :  { %v659_v42 = vpop.permute.xlu0 %658  ;;  %v657_v43 = vpop.permute.xlu1 %656  ;;  %v626_v58 = vadd.f32 %v624_v36, %v601_v45  ;;  %v633_v59 = vadd.f32 %v631_v39, %v608_v46  ;;  %v1072_v39 = vld [vmem:[%s1898_s2 + $0x288] sm:$0xff]  ;;  %v1071_v45 = vld [vmem:[%s1898_s2 + $0x280] sm:$0xff]  ;;  %v1074_v46 = vld [vmem:[%s1898_s2 + $0xb8] sm:$0xff] }
 0x3c3   :  { %v641_v7 = vadd.f32 %v639_v62, %v620_v48  ;;  %v664_v8 = vmul.f32 %v1056_v54, %v659_v42  ;;  %v648_v13 = vadd.f32 %v646_v63, %v627_v52  ;;  %v655_v14 = vadd.f32 %v653_v2, %v634_v53  ;;  %v1076_v52 = vld [vmem:[%s1898_s2 + $0x1a8] sm:$0xff] }
 0x3c4   :  { %v671_v15 = vmul.f32 %v1058_v60, %v659_v42  ;;  %v678_v16 = vmul.f32 %v1060_v61, %v659_v42  ;;  %v640_v18 = vadd.f32 %v638_v4, %v619_v57  ;;  %v647_v19 = vadd.f32 %v645_v38, %v626_v58  ;;  %v1073_v60 = vld [vmem:[%s1898_s2 + $0xb0] sm:$0xff]  ;;  %v1075_v61 = vld [vmem:[%s1898_s2 + $0x1a0] sm:$0xff]  ;;  %v1084_v38 = vld [vmem:[%s1898_s2 + $0x2a8] sm:$0xff] }
 0x3c5   :  { %v654_v20 = vadd.f32 %v652_v11, %v633_v59  ;;  %v663_v1 = vmul.f32 %v1055_v3, %v657_v43  ;;  %v670_v23 = vmul.f32 %v1057_v9, %v657_v43  ;;  %v677_v24 = vmul.f32 %v1059_v10, %v657_v43  ;;  %v1078_v59 = vld [vmem:[%s1898_s2 + $0x298] sm:$0xff]  ;;  %v1077_v4 = vld [vmem:[%s1898_s2 + $0x290] sm:$0xff]  ;;  %v1080_v9 = vld [vmem:[%s1898_s2 + $0xc8] sm:$0xff] }
 0x3c6   :  { %v684_v5 = vpop.permute.xlu0 %683  ;;  %v682_v6 = vpop.permute.xlu1 %681  ;;  %v666_v32 = vadd.f32 %v664_v8, %v641_v7  ;;  %v673_v34 = vadd.f32 %v671_v15, %v648_v13  ;;  %v680_v35 = vadd.f32 %v678_v16, %v655_v14  ;;  %v1082_v10 = vld [vmem:[%s1898_s2 + $0x1b8] sm:$0xff]  ;;  %v1079_v16 = vld [vmem:[%s1898_s2 + $0xc0] sm:$0xff] }
 0x3c7   :  { %v689_v25 = vmul.f32 %v1062_v12, %v684_v5  ;;  %v696_v33 = vmul.f32 %v1064_v17, %v684_v5  ;;  %v703_v0 = vmul.f32 %v1066_v21, %v684_v5  ;;  %v688_v36 = vmul.f32 %v1061_v37, %v682_v6  ;;  %v1081_v17 = vld [vmem:[%s1898_s2 + $0x1b0] sm:$0xff] }
 0x3c8   :  { %v695_v41 = vmul.f32 %v1063_v22, %v682_v6  ;;  %v702_v42 = vmul.f32 %v1065_v27, %v682_v6  ;;  %v665_v48 = vadd.f32 %v663_v1, %v640_v18  ;;  %v672_v50 = vadd.f32 %v670_v23, %v647_v19  ;;  %v1083_v18 = vld [vmem:[%s1898_s2 + $0x2a0] sm:$0xff]  ;;  %v1086_v27 = vld [vmem:[%s1898_s2 + $0xd8] sm:$0xff] }
 0x3c9   :  { %v679_v51 = vadd.f32 %v677_v24, %v654_v20  ;;  %v691_v49 = vadd.f32 %v689_v25, %v666_v32  ;;  %v698_v55 = vadd.f32 %v696_v33, %v673_v34  ;;  %v705_v62 = vadd.f32 %v703_v0, %v680_v35  ;;  %v1089_v34 = vld [vmem:[%s1898_s2 + $0x2b0] sm:$0xff] }
 0x3ca   :  { %v709_v30 = vpop.permute.xlu0 %708  ;;  %v707_v31 = vpop.permute.xlu1 %706  ;;  %v690_v63 = vadd.f32 %v688_v36, %v665_v48  ;;  %v697_v5 = vadd.f32 %v695_v41, %v672_v50 }
 0x3cb   :  { %v714_v43 = vmul.f32 %v1068_v28, %v709_v30  ;;  %v721_v44 = vmul.f32 %v1070_v29, %v709_v30  ;;  %v728_v56 = vmul.f32 %v1072_v39, %v709_v30  ;;  %v713_v57 = vmul.f32 %v1067_v47, %v707_v31  ;;  %v1090_v28 = vld [vmem:[%s1898_s2 + $0x2b8] sm:$0xff]  ;;  %v1085_v29 = vld [vmem:[%s1898_s2 + $0xd0] sm:$0xff] }
 0x3cc   :  { %v720_v58 = vmul.f32 %v1069_v40, %v707_v31  ;;  %v727_v2 = vmul.f32 %v1071_v45, %v707_v31  ;;  %v704_v6 = vadd.f32 %v702_v42, %v679_v51  ;;  %v1088_v42 = vld [vmem:[%s1898_s2 + $0x1c8] sm:$0xff]  ;;  %v1087_v45 = vld [vmem:[%s1898_s2 + $0x1c0] sm:$0xff] }
 0x3cd   :  { %v716_v7 = vadd.f32 %v714_v43, %v691_v49  ;;  %v723_v8 = vadd.f32 %v721_v44, %v698_v55  ;;  %v730_v20 = vadd.f32 %v728_v56, %v705_v62  ;;  %v715_v21 = vadd.f32 %v713_v57, %v690_v63  ;;  %v1092_v49 = vld [vmem:[%s1898_s2 + $0xe8] sm:$0xff] }
 0x3ce   :  { %v734_v53 = vpop.permute.xlu0 %733  ;;  %v732_v54 = vpop.permute.xlu1 %731  ;;  %v722_v37 = vadd.f32 %v720_v58, %v697_v5  ;;  %v729_v1 = vadd.f32 %v727_v2, %v704_v6  ;;  %v1094_v58 = vld [vmem:[%s1898_s2 + $0x1d8] sm:$0xff] }
 0x3cf   :  { %v739_v3 = vmul.f32 %v1074_v46, %v734_v53  ;;  %v746_v11 = vmul.f32 %v1076_v52, %v734_v53  ;;  %v753_v12 = vmul.f32 %v1078_v59, %v734_v53  ;;  %v738_v13 = vmul.f32 %v1073_v60, %v732_v54  ;;  %v1096_v52 = vld [vmem:[%s1898_s2 + $0x2c8] sm:$0xff]  ;;  %v1091_v53 = vld [vmem:[%s1898_s2 + $0xe0] sm:$0xff]  ;;  %v1093_v59 = vld [vmem:[%s1898_s2 + $0x1d0] sm:$0xff] }
 0x3d0   :  { %v745_v14 = vmul.f32 %v1075_v61, %v732_v54  ;;  %v752_v22 = vmul.f32 %v1077_v4, %v732_v54  ;;  %v1095_v60 = vld [vmem:[%s1898_s2 + $0x2c0] sm:$0xff] }
 0x3d1   :  { %v741_v23 = vadd.f32 %v739_v3, %v716_v7  ;;  %v748_v35 = vadd.f32 %v746_v11, %v723_v8  ;;  %v755_v0 = vadd.f32 %v753_v12, %v730_v20  ;;  %v740_v36 = vadd.f32 %v738_v13, %v715_v21 }
 0x3d2   :  { %v759_v15 = vpop.permute.xlu0 %758  ;;  %v757_v19 = vpop.permute.xlu1 %756  ;;  %v747_v39 = vadd.f32 %v745_v14, %v722_v37  ;;  %v754_v41 = vadd.f32 %v752_v22, %v729_v1 }
 0x3d3   :  { %v764_v24 = vmul.f32 %v1080_v9, %v759_v15  ;;  %v778_v25 = vmul.f32 %v1084_v38, %v759_v15  ;;  %v771_v30 = vmul.f32 %v1082_v10, %v759_v15  ;;  %v763_v31 = vmul.f32 %v1079_v16, %v757_v19 }
 0x3d4   :  { %v770_v32 = vmul.f32 %v1081_v17, %v757_v19  ;;  %v777_v33 = vmul.f32 %v1083_v18, %v757_v19 }
 0x3d5   :  { %v766_v48 = vadd.f32 %v764_v24, %v741_v23  ;;  %v780_v50 = vadd.f32 %v778_v25, %v755_v0  ;;  %v773_v54 = vadd.f32 %v771_v30, %v748_v35  ;;  %v765_v55 = vadd.f32 %v763_v31, %v740_v36 }
 0x3d6   :  { %v784_v47 = vpop.permute.xlu0 %783  ;;  %v782_v40 = vpop.permute.xlu1 %781  ;;  %v772_v56 = vadd.f32 %v770_v32, %v747_v39  ;;  %v779_v57 = vadd.f32 %v777_v33, %v754_v41 }
 0x3d7   :  { %v789_v43 = vmul.f32 %v1086_v27, %v784_v47  ;;  %v803_v44 = vmul.f32 %v1090_v28, %v784_v47  ;;  %v788_v46 = vmul.f32 %v1085_v29, %v782_v40  ;;  %v802_v51 = vmul.f32 %v1089_v34, %v782_v40 }
 0x3d8   :  { %v796_v62 = vmul.f32 %v1088_v42, %v784_v47  ;;  %v795_v2 = vmul.f32 %v1087_v45, %v782_v40 }
 0x3d9   :  { %v791_v61 = vadd.f32 %v789_v43, %v766_v48  ;;  %v805_v63 = vadd.f32 %v803_v44, %v780_v50  ;;  %v790_v5 = vadd.f32 %v788_v46, %v765_v55  ;;  %v804_v9 = vadd.f32 %v802_v51, %v779_v57 }
 0x3da   :  { %v809_v3 = vpop.permute.xlu0 %808  ;;  %v807_v4 = vpop.permute.xlu1 %806  ;;  %v798_v15 = vadd.f32 %v796_v62, %v773_v54  ;;  %v797_v16 = vadd.f32 %v795_v2, %v772_v56 }
 0x3db   :  { %v814_v6 = vmul.f32 %v1092_v49, %v809_v3  ;;  %v828_v7 = vmul.f32 %v1096_v52, %v809_v3  ;;  %v813_v8 = vmul.f32 %v1091_v53, %v807_v4  ;;  %v821_v10 = vmul.f32 %v1094_v58, %v809_v3  ;;  %v851_v3 = vld [vmem:[%s1897_s3 + $0x2] sm:$0x1] }
 0x3dc   :  { %v820_v38 = vmul.f32 %v1093_v59, %v807_v4  ;;  %v827_v11 = vmul.f32 %v1095_v60, %v807_v4 }
 0x3dd   :  { %v816_v12 = vadd.f32 %v814_v6, %v791_v61  ;;  %v830_v13 = vadd.f32 %v828_v7, %v805_v63  ;;  %v815_v14 = vadd.f32 %v813_v8, %v790_v5  ;;  %v823_v21 = vadd.f32 %v821_v10, %v798_v15  ;;  %v852_v6 = vld [vmem:[%s1897_s3 + $0x3] sm:$0x1] }
 0x3de   :  { %v829_v17 = vadd.f32 %v827_v11, %v804_v9  ;;  %v822_v37 = vadd.f32 %v820_v38, %v797_v16  ;;  %v1120_v16 = vld [vmem:[%s1895_s0 + $0x8] sm:$0xff] }
 0x3df   :  { %v834_v18 = vrot.slane %v816_v12, 7  ;;  %v842_v19 = vrot.slane %v830_v13, 1  ;;  %v833_v20 = vrot.slane %v815_v14, 7  ;;  %v1119_v14 = vld [vmem:[%s1895_s0] sm:$0xff] }
 0x3e0   :  { %v841_v22 = vrot.slane %v829_v17, 1 }
 0x3e1   :  { %v835_v1 = vsel %vm385_vm0, %v833_v20, %v834_v18  ;;  %v838_v23 = vsel %vm385_vm0, 0.0, %v833_v20  ;;  %v846_v28 = vsel %vm394_vm1, %v842_v19, 0.0 }
 0x3e2   :  { %v843_v24 = vsel %vm394_vm1, %v841_v22, %v842_v19  ;;  %v847_v25 = vadd.f32 %v838_v23, %v822_v37  ;;  %v848_v27 = vadd.f32 %v835_v1, %v823_v21 }
 0x3e4   :  { %v849_v29 = vadd.f32 %v847_v25, %v843_v24  ;;  %v850_v30 = vadd.f32 %v848_v27, %v846_v28 }
 0x3e6   :  { %v860_v31 = vmul.f32 %v849_v29, %v849_v29  ;;  %v853_v32 = vadd.f32 %v850_v30, %v849_v29  ;;  %v861_v33 = vmul.f32 %v850_v30, %v850_v30 }
 0x3e8   :  { %v854_v34 = vrot.slane %v853_v32, 4  ;;  %v862_v35 = vadd.f32 %v861_v33, %v860_v31 }
 0x3ea   :  { %v855_v0 = vadd.f32 %v854_v34, %v853_v32  ;;  %v863_v36 = vrot.slane %v862_v35, 4 }
 0x3ec   :  { %v856_v39 = vrot.slane %v855_v0, 2  ;;  %v864_v47 = vadd.f32 %v863_v36, %v862_v35 }
 0x3ee   :  { %v857_v40 = vadd.f32 %v856_v39, %v855_v0  ;;  %v865_v41 = vrot.slane %v864_v47, 2 }
 0x3f0   :  { %v858_v42 = vrot.slane %v857_v40, 1  ;;  %v866_v43 = vadd.f32 %v865_v41, %v864_v47 }
 0x3f2   :  { %v867_v44 = vrot.slane %v866_v43, 1  ;;  %v859_v45 = vadd.f32 %v858_v42, %v857_v40 }
 0x3f4   :  { %v868_v46 = vadd.f32 %v867_v44, %v866_v43 }
 0x3f6   :  { %v869_v48 = vsel %vm385_vm0, %v859_v45, %v868_v46 }
 0x3f7   :  { %870 = vrot.lane.b32.xlu1 %v869_v48, %s1124_s22 }
 0x469   :  { %v871_v50 = vpop.permute.xlu1 %870 }
 0x46a   :  { %v872_v51 = vadd.f32 %v871_v50, %v869_v48 }
 0x46c   :  { %873 = vrot.lane.b32.xlu0 %v872_v51, %s1135_s1 }
 0x4de   :  { %v874_v49 = vpop.permute.xlu0 %873 }
 0x4df   :  { %v875_v52 = vadd.f32 %v874_v49, %v872_v51 }
 0x4e1   :  { %876 = vrot.lane.b32.xlu1 %v875_v52, %s1136_s7 }
 0x553   :  { %v877_v53 = vpop.permute.xlu1 %876 }
 0x554   :  { %v878_v54 = vadd.f32 %v877_v53, %v875_v52 }
 0x556   :  { %879 = vrot.lane.b32.xlu0 %v878_v54, %s1137_s8 }
 0x5c8   :  { %v880_v55 = vpop.permute.xlu0 %879 }
 0x5c9   :  { %v881_v56 = vadd.f32 %v880_v55, %v878_v54 }
 0x5cb   :  { %882 = vrot.lane.b32.xlu1 %v881_v56, %s1138_s9 }
 0x63d   :  { %v883_v57 = vpop.permute.xlu1 %882 }
 0x63e   :  { %v884_v58 = vadd.f32 %v883_v57, %v881_v56 }
 0x640   :  { %v885_v59 = vmul.f32 0.001953125, %v884_v58 }
 0x642   :  { %v886_v60 = vmul.f32 %v885_v59, %v885_v59 }
 0x644   :  { %v888_v61 = vrot.slane %v886_v60, 7 }
 0x646   :  { %v890_v62 = vsub.f32 %v885_v59, %v888_v61 }
 0x648   :  { %v891_v63 = vadd.f32 1e-05, %v890_v62 }
 0x64a   :  { %1117 = vrsqrt.f32 %v891_v63 }
 0x657   :  { %v1118_v2 = vpop.eup %1117 }
 0x658   :  { %v894_v4 = vrot.slane %v1118_v2, 1 }
 0x65a   :  { %v896_v5 = vmul.f32 %v894_v4, %v851_v3 }
 0x65c   :  { %v897_v7 = vmul.f32 %v896_v5, %v885_v59  ;;  %v902_v8 = vrot.slane %v896_v5, %v1522_v26 }
 0x65e   :  { %v898_v9 = vsub.f32 %v852_v6, %v897_v7  ;;  %v903_v10 = vmul.f32 %v902_v8, %v849_v29  ;;  %v904_v38 = vmul.f32 %v902_v8, %v850_v30 }
 0x660   :  { %v908_v11 = vrot.slane %v898_v9, %v1522_v26 }
 0x662   :  { %v909_v12 = vadd.f32 %v908_v11, %v903_v10  ;;  %v910_v13 = vadd.f32 %v908_v11, %v904_v38 }
 0x664   :  { %v911_v15 = vadd.f32 %v1119_v14, %v909_v12  ;;  %v912_v17 = vadd.f32 %v1120_v16, %v910_v13 }
 0x666   :  { %v913_v18 = vmax.f32 %v911_v15, 0.0  ;;  %v914_v19 = vmax.f32 %v912_v17, 0.0 }
 0x668   :  { %915 = vst [vmem:[%s1899_s4] sm:$0xff] %v913_v18  ;;  %916 = vst [vmem:[%s1899_s4 + $0x8] sm:$0xff] %v914_v19 }

</bundles_post_ra>
